<compile_context>
chip_gen: v7x
topology: tpu7x:2x2x1
jax: 0.10.0
libtpu: 0.0.40
codegen_flags: <defaults>
</compile_context>

<pallas_src>
import functools

import jax
import jax.numpy as jnp
from jax.experimental import pallas as pl
from jax.experimental.pallas import tpu as pltpu

KW = 5      # Conv1d kernel_size
PAD = 5     # Conv1d padding
C = 64      # Conv1d out_channels
EPS = 1e-5
H1 = 360    # fc1 out_features (PyTorch)
H2 = 180    # fc2 out_features (PyTorch)
H1P = 384   # fc1 hidden padded to a lane multiple
H2P = 256   # fc2 hidden padded to a lane multiple


# --------------------------------------------------------------------------
# Fused kernel: conv1 -> BN -> ReLU -> pool -> conv2 -> BN -> ReLU -> pool
#               -> flatten -> fc1 -> ReLU -> fc2 -> ReLU -> fc3
# --------------------------------------------------------------------------
def _cnn1d_fused_kernel(x_ref, w1_ref, s1_ref, sh1_ref,
                        w2_ref, s2_ref, sh2_ref,
                        fc1w_ref, fc1b_ref, fc2w_ref, fc2b_ref,
                        fc3w_ref, fc3b_ref,
                        o_ref,
                        xp_ref, x2_ref, y2_ref,
                        *, tb, l_in, lp1, t1p, t2, t2p):
    # ---- stage 1: Conv1d(1->64, k=5, p=5) + BN + ReLU + MaxPool1d(2,2) ------
    # Zero-initialised scratches provide the conv zero padding in-kernel.
    xp_ref[...] = jnp.zeros_like(xp_ref)      # padded, lane-broadcast input
    x2_ref[...] = jnp.zeros_like(x2_ref)      # also supplies conv2's zero pads

    w1 = w1_ref[...]                          # (KW, C)  hoisted out of tap loop
    s1 = s1_ref[...]                          # (1, C)
    sh1 = sh1_ref[...]                        # (1, C)
    ones_c = jnp.ones((1, C), jnp.float32)    # hoisted lane-broadcast helper

    for b in range(tb):                       # static loop, tb <= 8
        base = b * lp1
        # write row b (broadcast across the 64 output channels) into the pad buffer
        xp_ref[base + PAD:base + PAD + l_in, :] = x_ref[b] * ones_c   # (L,1)*(1,C)

        # even / odd conv outputs computed separately; their max == MaxPool(2,2)
        acc_e = jnp.zeros((t1p, C), jnp.float32)
        acc_o = jnp.zeros((t1p, C), jnp.float32)
        for k in range(KW):                   # static tap loop (VPU work)
            wk = w1[k:k + 1, :]
            acc_e = acc_e + xp_ref[pl.ds(base + k, t1p, 2), :] * wk
            acc_o = acc_o + xp_ref[pl.ds(base + k + 1, t1p, 2), :] * wk
        pooled = jnp.maximum(jnp.maximum(acc_e * s1 + sh1, 0.0),
                             jnp.maximum(acc_o * s1 + sh1, 0.0))      # (t1p, C)

        # Scatter into conv2's im2col matrix: tap k sees `pooled` at row offset PAD-k
        for k in range(KW):
            r0 = b * t2 + (PAD - k)
            x2_ref[r0:r0 + t1p, k * C:(k + 1) * C] = pooled

    # ---- stage 2: Conv1d(64->64, k=5, p=5) as ONE deep matmul + BN + ReLU ---
    acc2 = jnp.dot(x2_ref[...], w2_ref[...],
                   preferred_element_type=jnp.float32)                # (tb*t2, C)
    y2_ref[...] = jnp.maximum(acc2 * s2_ref[...] + sh2_ref[...], 0.0)

    # ---- MaxPool1d(2,2) + flatten + fc1, fused as a chunked-K accumulation --
    # fc1 weight rows are stored time-major (t*C + c), so no transpose needed.
    h = jnp.zeros((tb, H1P), jnp.float32)
    for t in range(t2p):                      # static loop, t2p small
        gt = jnp.maximum(y2_ref[pl.ds(2 * t, tb, t2), :],
                         y2_ref[pl.ds(2 * t + 1, tb, t2), :])         # (tb, C)
        h = h + jnp.dot(gt, fc1w_ref[t * C:(t + 1) * C, :],
                        preferred_element_type=jnp.float32)

    # ---- MLP tail (dropout = identity in eval mode) -------------------------
    h = jnp.maximum(h + fc1b_ref[...], 0.0)
    h = jnp.dot(h, fc2w_ref[...], preferred_element_type=jnp.float32)
    h = jnp.maximum(h + fc2b_ref[...], 0.0)
    o_ref[...] = (jnp.dot(h, fc3w_ref[...], preferred_element_type=jnp.float32)
                  + fc3b_ref[...])


# --------------------------------------------------------------------------
# Wrapper: one pallas_call over batch tiles
# --------------------------------------------------------------------------
def cnn1d_forward(x, params, *, block_b=8):
    B, L = x.shape
    lp1 = L + 2 * PAD
    t1 = lp1 - KW + 1
    t1p = t1 // 2
    t2 = t1p + 2 * PAD - KW + 1
    t2p = t2 // 2
    flat = C * t2p

    tb = B if B <= block_b else block_b
    bp = ((B + tb - 1) // tb) * tb
    xin = x if bp == B else jnp.concatenate(
        [x, jnp.zeros((bp - B, L), x.dtype)], axis=0)
    xin = xin[..., None]                                   # (bp, L, 1)

    kernel = functools.partial(_cnn1d_fused_kernel, tb=tb, l_in=L, lp1=lp1,
                               t1p=t1p, t2=t2, t2p=t2p)
    out = pl.pallas_call(
        kernel,
        out_shape=jax.ShapeDtypeStruct((bp, 1), jnp.float32),
        grid=(bp // tb,),
        in_specs=[
            pl.BlockSpec((tb, L, 1), lambda i: (i, 0, 0)),   # x
            pl.BlockSpec((KW, C), lambda i: (0, 0)),         # conv1 weight [k, cout]
            pl.BlockSpec((1, C), lambda i: (0, 0)),          # bn1 folded scale
            pl.BlockSpec((1, C), lambda i: (0, 0)),          # bn1 folded shift
            pl.BlockSpec((KW * C, C), lambda i: (0, 0)),     # conv2 im2col weight
            pl.BlockSpec((1, C), lambda i: (0, 0)),          # bn2 folded scale
            pl.BlockSpec((1, C), lambda i: (0, 0)),          # bn2 folded shift
            pl.BlockSpec((flat, H1P), lambda i: (0, 0)),     # fc1 weight (time-major rows)
            pl.BlockSpec((1, H1P), lambda i: (0, 0)),        # fc1 bias (padded)
            pl.BlockSpec((H1P, H2P), lambda i: (0, 0)),      # fc2 weight (padded)
            pl.BlockSpec((1, H2P), lambda i: (0, 0)),        # fc2 bias (padded)
            pl.BlockSpec((H2P, 1), lambda i: (0, 0)),        # fc3 weight (padded)
            pl.BlockSpec((1, 1), lambda i: (0, 0)),          # fc3 bias
        ],
        out_specs=pl.BlockSpec((tb, 1), lambda i: (i, 0)),
        scratch_shapes=[
            pltpu.VMEM((tb * lp1, C), jnp.float32),       # padded, lane-broadcast input
            pltpu.VMEM((tb * t2, KW * C), jnp.float32),   # conv2 im2col matrix
            pltpu.VMEM((tb * t2, C), jnp.float32),        # conv2 activations (for pooling)
        ],
        compiler_params=pltpu.CompilerParams(
            dimension_semantics=("parallel",)),            # v7x: shard batch over 2 TCs
    )(xin, params["w1t"], params["scale1"], params["shift1"],
      params["w2col"], params["scale2"], params["shift2"],
      params["fc1_wt"], params["fc1_b"], params["fc2_wt"], params["fc2_b"],
      params["fc3_wt"], params["fc3_b"])
    return out[:B]


# --------------------------------------------------------------------------
# Deterministic parameter initialization (shapes match the PyTorch module)
# --------------------------------------------------------------------------
def _dims(input_size):
    t1 = input_size + 2 * PAD - KW + 1      # conv1 output length
    t1p = t1 // 2                           # after max_pool1
    t2 = t1p + 2 * PAD - KW + 1             # conv2 output length
    t2p = t2 // 2                           # after max_pool2
    return t1, t1p, t2, t2p


def init_params(key, input_size):
    _, _, _, t2p = _dims(input_size)
    flat = C * t2p
    ks = jax.random.split(key, 18)

    # conv1 (torch: weight (64,1,5), bias (64,)) + BN1 running stats
    w1 = 0.2 * jax.random.normal(ks[0], (C, 1, KW), jnp.float32)
    b1 = 0.1 * jax.random.normal(ks[1], (C,), jnp.float32)
    g1 = 1.0 + 0.1 * jax.random.normal(ks[2], (C,), jnp.float32)
    be1 = 0.1 * jax.random.normal(ks[3], (C,), jnp.float32)
    m1 = 0.05 * jax.random.normal(ks[4], (C,), jnp.float32)
    v1 = 1.0 + 0.1 * jax.random.uniform(ks[5], (C,), jnp.float32)
    scale1 = g1 / jnp.sqrt(v1 + EPS)
    shift1 = (b1 - m1) * scale1 + be1

    # conv2 (weight (64,64,5), bias (64,)) + BN2 running stats
    w2 = 0.05 * jax.random.normal(ks[6], (C, C, KW), jnp.float32)
    b2 = 0.1 * jax.random.normal(ks[7], (C,), jnp.float32)
    g2 = 1.0 + 0.1 * jax.random.normal(ks[8], (C,), jnp.float32)
    be2 = 0.1 * jax.random.normal(ks[9], (C,), jnp.float32)
    m2 = 0.05 * jax.random.normal(ks[10], (C,), jnp.float32)
    v2 = 1.0 + 0.1 * jax.random.uniform(ks[11], (C,), jnp.float32)
    scale2 = g2 / jnp.sqrt(v2 + EPS)
    shift2 = (b2 - m2) * scale2 + be2

    # MLP: fc1 (360, flat), fc2 (180, 360), fc3 (1, 180)
    fc1_w = 0.05 * jax.random.normal(ks[12], (H1, flat), jnp.float32)
    fc1_b = 0.1 * jax.random.normal(ks[13], (H1,), jnp.float32)
    fc2_w = 0.05 * jax.random.normal(ks[14], (H2, H1), jnp.float32)
    fc2_b = 0.1 * jax.random.normal(ks[15], (H2,), jnp.float32)
    fc3_w = 0.05 * jax.random.normal(ks[16], (1, H2), jnp.float32)
    fc3_b = 0.1 * jax.random.normal(ks[17], (1,), jnp.float32)

    # conv1 weight -> [tap, out_channel]
    w1t = jnp.transpose(w1[:, 0, :], (1, 0))                     # (KW, C)
    # conv2 weight -> im2col layout [tap*C + in_channel, out_channel]
    w2col = jnp.transpose(w2, (2, 1, 0)).reshape(KW * C, C)      # (320, C)

    # fc1: transpose, permute rows channel-major -> time-major (kernel flattens
    # h2 time-major), then zero-pad 360 -> 384.
    idx = jnp.arange(flat)
    perm = (idx % C) * t2p + idx // C     # row (t*C + c)  <-  channel-major (c*t2p + t)
    fc1_wt = jnp.zeros((flat, H1P), jnp.float32).at[:, :H1].set(fc1_w.T[perm])
    fc1_bp = jnp.zeros((1, H1P), jnp.float32).at[0, :H1].set(fc1_b)
    fc2_wt = jnp.zeros((H1P, H2P), jnp.float32).at[:H1, :H2].set(fc2_w.T)
    fc2_bp = jnp.zeros((1, H2P), jnp.float32).at[0, :H2].set(fc2_b)
    fc3_wt = jnp.zeros((H2P, 1), jnp.float32).at[:H2, :].set(fc3_w.T)
    fc3_bp = fc3_b[None, :]

    return {
        "w1t": w1t,
        "scale1": scale1[None, :], "shift1": shift1[None, :],
        "w2col": w2col,
        "scale2": scale2[None, :], "shift2": shift2[None, :],
        "fc1_wt": fc1_wt, "fc1_b": fc1_bp,
        "fc2_wt": fc2_wt, "fc2_b": fc2_bp,
        "fc3_wt": fc3_wt, "fc3_b": fc3_bp,
    }


if __name__ == "__main__":
    input_size = 16   # small length consistent with the module (any L works)
    batch = 2
    key = jax.random.PRNGKey(0)
    pkey, xkey = jax.random.split(key)
    params = init_params(pkey, input_size)
    x = jax.random.normal(xkey, (batch, input_size), jnp.float32)

    out = jax.jit(cnn1d_forward)(x, params)
    out = jax.block_until_ready(out)
    assert out.shape == (batch, 1) and out.dtype == jnp.float32
    print("KERNEL_OK")
</pallas_src>

<mosaic_0001>
module attributes {stable_mosaic.version = 11 : i64} {
  func.func @_cnn1d_fused_kernel(%arg0: i32, %arg1: memref<2x16x1xf32, #tpu.memory_space<vmem>>, %arg2: memref<5x64xf32, #tpu.memory_space<vmem>>, %arg3: memref<1x64xf32, #tpu.memory_space<vmem>>, %arg4: memref<1x64xf32, #tpu.memory_space<vmem>>, %arg5: memref<320x64xf32, #tpu.memory_space<vmem>>, %arg6: memref<1x64xf32, #tpu.memory_space<vmem>>, %arg7: memref<1x64xf32, #tpu.memory_space<vmem>>, %arg8: memref<512x384xf32, #tpu.memory_space<vmem>>, %arg9: memref<1x384xf32, #tpu.memory_space<vmem>>, %arg10: memref<384x256xf32, #tpu.memory_space<vmem>>, %arg11: memref<1x256xf32, #tpu.memory_space<vmem>>, %arg12: memref<256x1xf32, #tpu.memory_space<vmem>>, %arg13: memref<1x1xf32, #tpu.memory_space<vmem>>, %arg14: memref<2x1xf32, #tpu.memory_space<vmem>>, %arg15: memref<52x64xf32, #tpu.memory_space<vmem>>, %arg16: memref<34x320xf32, #tpu.memory_space<vmem>>, %arg17: memref<34x64xf32, #tpu.memory_space<vmem>>) attributes {dimension_semantics = [#tpu.dimension_semantics<parallel>], iteration_bounds = array<i64: 1>, scalar_prefetch = 0 : i64, scratch_operands = 3 : i64, tpu.core_type = #tpu.core_type<tc>, window_params = [{transform_indices = @transform_0, window_bounds = array<i64: 2, 16, 1>}, {pipeline_mode = #tpu.pipeline_mode<synchronous>, transform_indices = @transform_1, window_bounds = array<i64: 5, 64>}, {pipeline_mode = #tpu.pipeline_mode<synchronous>, transform_indices = @transform_2, window_bounds = array<i64: 1, 64>}, {pipeline_mode = #tpu.pipeline_mode<synchronous>, transform_indices = @transform_3, window_bounds = array<i64: 1, 64>}, {pipeline_mode = #tpu.pipeline_mode<synchronous>, transform_indices = @transform_4, window_bounds = array<i64: 320, 64>}, {pipeline_mode = #tpu.pipeline_mode<synchronous>, transform_indices = @transform_5, window_bounds = array<i64: 1, 64>}, {pipeline_mode = #tpu.pipeline_mode<synchronous>, transform_indices = @transform_6, window_bounds = array<i64: 1, 64>}, {pipeline_mode = #tpu.pipeline_mode<synchronous>, transform_indices = @transform_7, window_bounds = array<i64: 512, 384>}, {pipeline_mode = #tpu.pipeline_mode<synchronous>, transform_indices = @transform_8, window_bounds = array<i64: 1, 384>}, {pipeline_mode = #tpu.pipeline_mode<synchronous>, transform_indices = @transform_9, window_bounds = array<i64: 384, 256>}, {pipeline_mode = #tpu.pipeline_mode<synchronous>, transform_indices = @transform_10, window_bounds = array<i64: 1, 256>}, {pipeline_mode = #tpu.pipeline_mode<synchronous>, transform_indices = @transform_11, window_bounds = array<i64: 256, 1>}, {pipeline_mode = #tpu.pipeline_mode<synchronous>, transform_indices = @transform_12, window_bounds = array<i64: 1, 1>}, {transform_indices = @transform_13, window_bounds = array<i64: 2, 1>}]} {
    %cst = arith.constant 0.000000e+00 : f32
    %0 = vector.broadcast %cst : f32 to vector<52x64xf32>
    %c0 = arith.constant 0 : index
    %c0_0 = arith.constant 0 : index
    %1 = vector.load %arg15[%c0, %c0_0] : memref<52x64xf32, #tpu.memory_space<vmem>>, vector<52x64xf32>
    tpu.vector_store %arg15[%c0, %c0_0], %0 {strides = array<i32>} : memref<52x64xf32, #tpu.memory_space<vmem>>, vector<52x64xf32>,
    %cst_1 = arith.constant 0.000000e+00 : f32
    %2 = vector.broadcast %cst_1 : f32 to vector<34x320xf32>
    %c0_2 = arith.constant 0 : index
    %c0_3 = arith.constant 0 : index
    %3 = vector.load %arg16[%c0_2, %c0_3] : memref<34x320xf32, #tpu.memory_space<vmem>>, vector<34x320xf32>
    tpu.vector_store %arg16[%c0_2, %c0_3], %2 {strides = array<i32>} : memref<34x320xf32, #tpu.memory_space<vmem>>, vector<34x320xf32>,
    %c0_4 = arith.constant 0 : index
    %c0_5 = arith.constant 0 : index
    %4 = vector.load %arg2[%c0_4, %c0_5] : memref<5x64xf32, #tpu.memory_space<vmem>>, vector<5x64xf32>
    %c0_6 = arith.constant 0 : index
    %c0_7 = arith.constant 0 : index
    %5 = vector.load %arg3[%c0_6, %c0_7] : memref<1x64xf32, #tpu.memory_space<vmem>>, vector<1x64xf32>
    %c0_8 = arith.constant 0 : index
    %c0_9 = arith.constant 0 : index
    %6 = vector.load %arg4[%c0_8, %c0_9] : memref<1x64xf32, #tpu.memory_space<vmem>>, vector<1x64xf32>
    %cst_10 = arith.constant 1.000000e+00 : f32
    %7 = vector.broadcast %cst_10 : f32 to vector<1x64xf32>
    %c0_11 = arith.constant 0 : index
    %c0_12 = arith.constant 0 : index
    %c0_13 = arith.constant 0 : index
    %8 = vector.load %arg1[%c0_11, %c0_12, %c0_13] : memref<2x16x1xf32, #tpu.memory_space<vmem>>, vector<1x16x1xf32>
    %9 = vector.shape_cast %8 : vector<1x16x1xf32> to vector<16x1xf32>
    %10 = vector.broadcast %9 : vector<16x1xf32> to vector<16x64xf32>
    %11 = vector.broadcast %7 : vector<1x64xf32> to vector<16x64xf32>
    %12 = arith.mulf %10, %11 : vector<16x64xf32>
    %c5 = arith.constant 5 : index
    %c0_14 = arith.constant 0 : index
    %13 = vector.load %arg15[%c5, %c0_14] : memref<52x64xf32, #tpu.memory_space<vmem>>, vector<16x64xf32>
    tpu.vector_store %arg15[%c5, %c0_14], %12 {strides = array<i32>} : memref<52x64xf32, #tpu.memory_space<vmem>>, vector<16x64xf32>,
    %cst_15 = arith.constant 0.000000e+00 : f32
    %14 = vector.broadcast %cst_15 : f32 to vector<11x64xf32>
    %cst_16 = arith.constant 0.000000e+00 : f32
    %15 = vector.broadcast %cst_16 : f32 to vector<11x64xf32>
    %16 = vector.extract_strided_slice %4 {offsets = [0, 0], sizes = [1, 64], strides = [1, 1]} : vector<5x64xf32> to vector<1x64xf32>
    %c0_17 = arith.constant 0 : index
    %c0_18 = arith.constant 0 : index
    %17 = tpu.strided_load %arg15[%c0_17, %c0_18] {strides = array<i32: 2, 1>} : memref<52x64xf32, #tpu.memory_space<vmem>>, vector<11x64xf32>
    %18 = vector.broadcast %16 : vector<1x64xf32> to vector<11x64xf32>
    %19 = arith.mulf %17, %18 : vector<11x64xf32>
    %20 = arith.addf %14, %19 : vector<11x64xf32>
    %c1 = arith.constant 1 : index
    %c0_19 = arith.constant 0 : index
    %21 = tpu.strided_load %arg15[%c1, %c0_19] {strides = array<i32: 2, 1>} : memref<52x64xf32, #tpu.memory_space<vmem>>, vector<11x64xf32>
    %22 = vector.broadcast %16 : vector<1x64xf32> to vector<11x64xf32>
    %23 = arith.mulf %21, %22 : vector<11x64xf32>
    %24 = arith.addf %15, %23 : vector<11x64xf32>
    %25 = vector.extract_strided_slice %4 {offsets = [1, 0], sizes = [1, 64], strides = [1, 1]} : vector<5x64xf32> to vector<1x64xf32>
    %c1_20 = arith.constant 1 : index
    %c0_21 = arith.constant 0 : index
    %26 = tpu.strided_load %arg15[%c1_20, %c0_21] {strides = array<i32: 2, 1>} : memref<52x64xf32, #tpu.memory_space<vmem>>, vector<11x64xf32>
    %27 = vector.broadcast %25 : vector<1x64xf32> to vector<11x64xf32>
    %28 = arith.mulf %26, %27 : vector<11x64xf32>
    %29 = arith.addf %20, %28 : vector<11x64xf32>
    %c2 = arith.constant 2 : index
    %c0_22 = arith.constant 0 : index
    %30 = tpu.strided_load %arg15[%c2, %c0_22] {strides = array<i32: 2, 1>} : memref<52x64xf32, #tpu.memory_space<vmem>>, vector<11x64xf32>
    %31 = vector.broadcast %25 : vector<1x64xf32> to vector<11x64xf32>
    %32 = arith.mulf %30, %31 : vector<11x64xf32>
    %33 = arith.addf %24, %32 : vector<11x64xf32>
    %34 = vector.extract_strided_slice %4 {offsets = [2, 0], sizes = [1, 64], strides = [1, 1]} : vector<5x64xf32> to vector<1x64xf32>
    %c2_23 = arith.constant 2 : index
    %c0_24 = arith.constant 0 : index
    %35 = tpu.strided_load %arg15[%c2_23, %c0_24] {strides = array<i32: 2, 1>} : memref<52x64xf32, #tpu.memory_space<vmem>>, vector<11x64xf32>
    %36 = vector.broadcast %34 : vector<1x64xf32> to vector<11x64xf32>
    %37 = arith.mulf %35, %36 : vector<11x64xf32>
    %38 = arith.addf %29, %37 : vector<11x64xf32>
    %c3 = arith.constant 3 : index
    %c0_25 = arith.constant 0 : index
    %39 = tpu.strided_load %arg15[%c3, %c0_25] {strides = array<i32: 2, 1>} : memref<52x64xf32, #tpu.memory_space<vmem>>, vector<11x64xf32>
    %40 = vector.broadcast %34 : vector<1x64xf32> to vector<11x64xf32>
    %41 = arith.mulf %39, %40 : vector<11x64xf32>
    %42 = arith.addf %33, %41 : vector<11x64xf32>
    %43 = vector.extract_strided_slice %4 {offsets = [3, 0], sizes = [1, 64], strides = [1, 1]} : vector<5x64xf32> to vector<1x64xf32>
    %c3_26 = arith.constant 3 : index
    %c0_27 = arith.constant 0 : index
    %44 = tpu.strided_load %arg15[%c3_26, %c0_27] {strides = array<i32: 2, 1>} : memref<52x64xf32, #tpu.memory_space<vmem>>, vector<11x64xf32>
    %45 = vector.broadcast %43 : vector<1x64xf32> to vector<11x64xf32>
    %46 = arith.mulf %44, %45 : vector<11x64xf32>
    %47 = arith.addf %38, %46 : vector<11x64xf32>
    %c4 = arith.constant 4 : index
    %c0_28 = arith.constant 0 : index
    %48 = tpu.strided_load %arg15[%c4, %c0_28] {strides = array<i32: 2, 1>} : memref<52x64xf32, #tpu.memory_space<vmem>>, vector<11x64xf32>
    %49 = vector.broadcast %43 : vector<1x64xf32> to vector<11x64xf32>
    %50 = arith.mulf %48, %49 : vector<11x64xf32>
    %51 = arith.addf %42, %50 : vector<11x64xf32>
    %52 = vector.extract_strided_slice %4 {offsets = [4, 0], sizes = [1, 64], strides = [1, 1]} : vector<5x64xf32> to vector<1x64xf32>
    %c4_29 = arith.constant 4 : index
    %c0_30 = arith.constant 0 : index
    %53 = tpu.strided_load %arg15[%c4_29, %c0_30] {strides = array<i32: 2, 1>} : memref<52x64xf32, #tpu.memory_space<vmem>>, vector<11x64xf32>
    %54 = vector.broadcast %52 : vector<1x64xf32> to vector<11x64xf32>
    %55 = arith.mulf %53, %54 : vector<11x64xf32>
    %56 = arith.addf %47, %55 : vector<11x64xf32>
    %c5_31 = arith.constant 5 : index
    %c0_32 = arith.constant 0 : index
    %57 = tpu.strided_load %arg15[%c5_31, %c0_32] {strides = array<i32: 2, 1>} : memref<52x64xf32, #tpu.memory_space<vmem>>, vector<11x64xf32>
    %58 = vector.broadcast %52 : vector<1x64xf32> to vector<11x64xf32>
    %59 = arith.mulf %57, %58 : vector<11x64xf32>
    %60 = arith.addf %51, %59 : vector<11x64xf32>
    %61 = vector.broadcast %5 : vector<1x64xf32> to vector<11x64xf32>
    %62 = arith.mulf %56, %61 : vector<11x64xf32>
    %63 = vector.broadcast %6 : vector<1x64xf32> to vector<11x64xf32>
    %64 = arith.addf %62, %63 : vector<11x64xf32>
    %cst_33 = arith.constant 0.000000e+00 : f32
    %65 = vector.broadcast %cst_33 : f32 to vector<11x64xf32>
    %66 = arith.maximumf %64, %65 : vector<11x64xf32>
    %67 = vector.broadcast %5 : vector<1x64xf32> to vector<11x64xf32>
    %68 = arith.mulf %60, %67 : vector<11x64xf32>
    %69 = vector.broadcast %6 : vector<1x64xf32> to vector<11x64xf32>
    %70 = arith.addf %68, %69 : vector<11x64xf32>
    %cst_34 = arith.constant 0.000000e+00 : f32
    %71 = vector.broadcast %cst_34 : f32 to vector<11x64xf32>
    %72 = arith.maximumf %70, %71 : vector<11x64xf32>
    %73 = arith.maximumf %66, %72 : vector<11x64xf32>
    %c5_35 = arith.constant 5 : index
    %c0_36 = arith.constant 0 : index
    %74 = vector.load %arg16[%c5_35, %c0_36] : memref<34x320xf32, #tpu.memory_space<vmem>>, vector<11x64xf32>
    tpu.vector_store %arg16[%c5_35, %c0_36], %73 {strides = array<i32>} : memref<34x320xf32, #tpu.memory_space<vmem>>, vector<11x64xf32>,
    %c4_37 = arith.constant 4 : index
    %c64 = arith.constant 64 : index
    %75 = vector.load %arg16[%c4_37, %c64] : memref<34x320xf32, #tpu.memory_space<vmem>>, vector<11x64xf32>
    tpu.vector_store %arg16[%c4_37, %c64], %73 {strides = array<i32>} : memref<34x320xf32, #tpu.memory_space<vmem>>, vector<11x64xf32>,
    %c3_38 = arith.constant 3 : index
    %c128 = arith.constant 128 : index
    %76 = vector.load %arg16[%c3_38, %c128] : memref<34x320xf32, #tpu.memory_space<vmem>>, vector<11x64xf32>
    tpu.vector_store %arg16[%c3_38, %c128], %73 {strides = array<i32>} : memref<34x320xf32, #tpu.memory_space<vmem>>, vector<11x64xf32>,
    %c2_39 = arith.constant 2 : index
    %c192 = arith.constant 192 : index
    %77 = vector.load %arg16[%c2_39, %c192] : memref<34x320xf32, #tpu.memory_space<vmem>>, vector<11x64xf32>
    tpu.vector_store %arg16[%c2_39, %c192], %73 {strides = array<i32>} : memref<34x320xf32, #tpu.memory_space<vmem>>, vector<11x64xf32>,
    %c1_40 = arith.constant 1 : index
    %c256 = arith.constant 256 : index
    %78 = vector.load %arg16[%c1_40, %c256] : memref<34x320xf32, #tpu.memory_space<vmem>>, vector<11x64xf32>
    tpu.vector_store %arg16[%c1_40, %c256], %73 {strides = array<i32>} : memref<34x320xf32, #tpu.memory_space<vmem>>, vector<11x64xf32>,
    %c1_41 = arith.constant 1 : index
    %c0_42 = arith.constant 0 : index
    %c0_43 = arith.constant 0 : index
    %79 = vector.load %arg1[%c1_41, %c0_42, %c0_43] : memref<2x16x1xf32, #tpu.memory_space<vmem>>, vector<1x16x1xf32>
    %80 = vector.shape_cast %79 : vector<1x16x1xf32> to vector<16x1xf32>
    %81 = vector.broadcast %80 : vector<16x1xf32> to vector<16x64xf32>
    %82 = vector.broadcast %7 : vector<1x64xf32> to vector<16x64xf32>
    %83 = arith.mulf %81, %82 : vector<16x64xf32>
    %c31 = arith.constant 31 : index
    %c0_44 = arith.constant 0 : index
    %84 = vector.load %arg15[%c31, %c0_44] : memref<52x64xf32, #tpu.memory_space<vmem>>, vector<16x64xf32>
    tpu.vector_store %arg15[%c31, %c0_44], %83 {strides = array<i32>} : memref<52x64xf32, #tpu.memory_space<vmem>>, vector<16x64xf32>,
    %cst_45 = arith.constant 0.000000e+00 : f32
    %85 = vector.broadcast %cst_45 : f32 to vector<11x64xf32>
    %cst_46 = arith.constant 0.000000e+00 : f32
    %86 = vector.broadcast %cst_46 : f32 to vector<11x64xf32>
    %87 = vector.extract_strided_slice %4 {offsets = [0, 0], sizes = [1, 64], strides = [1, 1]} : vector<5x64xf32> to vector<1x64xf32>
    %c26 = arith.constant 26 : index
    %c0_47 = arith.constant 0 : index
    %88 = tpu.strided_load %arg15[%c26, %c0_47] {strides = array<i32: 2, 1>} : memref<52x64xf32, #tpu.memory_space<vmem>>, vector<11x64xf32>
    %89 = vector.broadcast %87 : vector<1x64xf32> to vector<11x64xf32>
    %90 = arith.mulf %88, %89 : vector<11x64xf32>
    %91 = arith.addf %85, %90 : vector<11x64xf32>
    %c27 = arith.constant 27 : index
    %c0_48 = arith.constant 0 : index
    %92 = tpu.strided_load %arg15[%c27, %c0_48] {strides = array<i32: 2, 1>} : memref<52x64xf32, #tpu.memory_space<vmem>>, vector<11x64xf32>
    %93 = vector.broadcast %87 : vector<1x64xf32> to vector<11x64xf32>
    %94 = arith.mulf %92, %93 : vector<11x64xf32>
    %95 = arith.addf %86, %94 : vector<11x64xf32>
    %96 = vector.extract_strided_slice %4 {offsets = [1, 0], sizes = [1, 64], strides = [1, 1]} : vector<5x64xf32> to vector<1x64xf32>
    %c27_49 = arith.constant 27 : index
    %c0_50 = arith.constant 0 : index
    %97 = tpu.strided_load %arg15[%c27_49, %c0_50] {strides = array<i32: 2, 1>} : memref<52x64xf32, #tpu.memory_space<vmem>>, vector<11x64xf32>
    %98 = vector.broadcast %96 : vector<1x64xf32> to vector<11x64xf32>
    %99 = arith.mulf %97, %98 : vector<11x64xf32>
    %100 = arith.addf %91, %99 : vector<11x64xf32>
    %c28 = arith.constant 28 : index
    %c0_51 = arith.constant 0 : index
    %101 = tpu.strided_load %arg15[%c28, %c0_51] {strides = array<i32: 2, 1>} : memref<52x64xf32, #tpu.memory_space<vmem>>, vector<11x64xf32>
    %102 = vector.broadcast %96 : vector<1x64xf32> to vector<11x64xf32>
    %103 = arith.mulf %101, %102 : vector<11x64xf32>
    %104 = arith.addf %95, %103 : vector<11x64xf32>
    %105 = vector.extract_strided_slice %4 {offsets = [2, 0], sizes = [1, 64], strides = [1, 1]} : vector<5x64xf32> to vector<1x64xf32>
    %c28_52 = arith.constant 28 : index
    %c0_53 = arith.constant 0 : index
    %106 = tpu.strided_load %arg15[%c28_52, %c0_53] {strides = array<i32: 2, 1>} : memref<52x64xf32, #tpu.memory_space<vmem>>, vector<11x64xf32>
    %107 = vector.broadcast %105 : vector<1x64xf32> to vector<11x64xf32>
    %108 = arith.mulf %106, %107 : vector<11x64xf32>
    %109 = arith.addf %100, %108 : vector<11x64xf32>
    %c29 = arith.constant 29 : index
    %c0_54 = arith.constant 0 : index
    %110 = tpu.strided_load %arg15[%c29, %c0_54] {strides = array<i32: 2, 1>} : memref<52x64xf32, #tpu.memory_space<vmem>>, vector<11x64xf32>
    %111 = vector.broadcast %105 : vector<1x64xf32> to vector<11x64xf32>
    %112 = arith.mulf %110, %111 : vector<11x64xf32>
    %113 = arith.addf %104, %112 : vector<11x64xf32>
    %114 = vector.extract_strided_slice %4 {offsets = [3, 0], sizes = [1, 64], strides = [1, 1]} : vector<5x64xf32> to vector<1x64xf32>
    %c29_55 = arith.constant 29 : index
    %c0_56 = arith.constant 0 : index
    %115 = tpu.strided_load %arg15[%c29_55, %c0_56] {strides = array<i32: 2, 1>} : memref<52x64xf32, #tpu.memory_space<vmem>>, vector<11x64xf32>
    %116 = vector.broadcast %114 : vector<1x64xf32> to vector<11x64xf32>
    %117 = arith.mulf %115, %116 : vector<11x64xf32>
    %118 = arith.addf %109, %117 : vector<11x64xf32>
    %c30 = arith.constant 30 : index
    %c0_57 = arith.constant 0 : index
    %119 = tpu.strided_load %arg15[%c30, %c0_57] {strides = array<i32: 2, 1>} : memref<52x64xf32, #tpu.memory_space<vmem>>, vector<11x64xf32>
    %120 = vector.broadcast %114 : vector<1x64xf32> to vector<11x64xf32>
    %121 = arith.mulf %119, %120 : vector<11x64xf32>
    %122 = arith.addf %113, %121 : vector<11x64xf32>
    %123 = vector.extract_strided_slice %4 {offsets = [4, 0], sizes = [1, 64], strides = [1, 1]} : vector<5x64xf32> to vector<1x64xf32>
    %c30_58 = arith.constant 30 : index
    %c0_59 = arith.constant 0 : index
    %124 = tpu.strided_load %arg15[%c30_58, %c0_59] {strides = array<i32: 2, 1>} : memref<52x64xf32, #tpu.memory_space<vmem>>, vector<11x64xf32>
    %125 = vector.broadcast %123 : vector<1x64xf32> to vector<11x64xf32>
    %126 = arith.mulf %124, %125 : vector<11x64xf32>
    %127 = arith.addf %118, %126 : vector<11x64xf32>
    %c31_60 = arith.constant 31 : index
    %c0_61 = arith.constant 0 : index
    %128 = tpu.strided_load %arg15[%c31_60, %c0_61] {strides = array<i32: 2, 1>} : memref<52x64xf32, #tpu.memory_space<vmem>>, vector<11x64xf32>
    %129 = vector.broadcast %123 : vector<1x64xf32> to vector<11x64xf32>
    %130 = arith.mulf %128, %129 : vector<11x64xf32>
    %131 = arith.addf %122, %130 : vector<11x64xf32>
    %132 = vector.broadcast %5 : vector<1x64xf32> to vector<11x64xf32>
    %133 = arith.mulf %127, %132 : vector<11x64xf32>
    %134 = vector.broadcast %6 : vector<1x64xf32> to vector<11x64xf32>
    %135 = arith.addf %133, %134 : vector<11x64xf32>
    %cst_62 = arith.constant 0.000000e+00 : f32
    %136 = vector.broadcast %cst_62 : f32 to vector<11x64xf32>
    %137 = arith.maximumf %135, %136 : vector<11x64xf32>
    %138 = vector.broadcast %5 : vector<1x64xf32> to vector<11x64xf32>
    %139 = arith.mulf %131, %138 : vector<11x64xf32>
    %140 = vector.broadcast %6 : vector<1x64xf32> to vector<11x64xf32>
    %141 = arith.addf %139, %140 : vector<11x64xf32>
    %cst_63 = arith.constant 0.000000e+00 : f32
    %142 = vector.broadcast %cst_63 : f32 to vector<11x64xf32>
    %143 = arith.maximumf %141, %142 : vector<11x64xf32>
    %144 = arith.maximumf %137, %143 : vector<11x64xf32>
    %c22 = arith.constant 22 : index
    %c0_64 = arith.constant 0 : index
    %145 = vector.load %arg16[%c22, %c0_64] : memref<34x320xf32, #tpu.memory_space<vmem>>, vector<11x64xf32>
    tpu.vector_store %arg16[%c22, %c0_64], %144 {strides = array<i32>} : memref<34x320xf32, #tpu.memory_space<vmem>>, vector<11x64xf32>,
    %c21 = arith.constant 21 : index
    %c64_65 = arith.constant 64 : index
    %146 = vector.load %arg16[%c21, %c64_65] : memref<34x320xf32, #tpu.memory_space<vmem>>, vector<11x64xf32>
    tpu.vector_store %arg16[%c21, %c64_65], %144 {strides = array<i32>} : memref<34x320xf32, #tpu.memory_space<vmem>>, vector<11x64xf32>,
    %c20 = arith.constant 20 : index
    %c128_66 = arith.constant 128 : index
    %147 = vector.load %arg16[%c20, %c128_66] : memref<34x320xf32, #tpu.memory_space<vmem>>, vector<11x64xf32>
    tpu.vector_store %arg16[%c20, %c128_66], %144 {strides = array<i32>} : memref<34x320xf32, #tpu.memory_space<vmem>>, vector<11x64xf32>,
    %c19 = arith.constant 19 : index
    %c192_67 = arith.constant 192 : index
    %148 = vector.load %arg16[%c19, %c192_67] : memref<34x320xf32, #tpu.memory_space<vmem>>, vector<11x64xf32>
    tpu.vector_store %arg16[%c19, %c192_67], %144 {strides = array<i32>} : memref<34x320xf32, #tpu.memory_space<vmem>>, vector<11x64xf32>,
    %c18 = arith.constant 18 : index
    %c256_68 = arith.constant 256 : index
    %149 = vector.load %arg16[%c18, %c256_68] : memref<34x320xf32, #tpu.memory_space<vmem>>, vector<11x64xf32>
    tpu.vector_store %arg16[%c18, %c256_68], %144 {strides = array<i32>} : memref<34x320xf32, #tpu.memory_space<vmem>>, vector<11x64xf32>,
    %c0_69 = arith.constant 0 : index
    %c0_70 = arith.constant 0 : index
    %150 = vector.load %arg16[%c0_69, %c0_70] : memref<34x320xf32, #tpu.memory_space<vmem>>, vector<34x320xf32>
    %c0_71 = arith.constant 0 : index
    %c0_72 = arith.constant 0 : index
    %151 = vector.load %arg5[%c0_71, %c0_72] : memref<320x64xf32, #tpu.memory_space<vmem>>, vector<320x64xf32>
    %cst_73 = arith.constant dense<0.000000e+00> : vector<34x64xf32>
    %152 = tpu.matmul %150, %151, %cst_73 {dimension_numbers = #tpu.dot_dimension_numbers<[1], [0], [0], [1], [0, 0, 1, 1], [], []>} : vector<34x320xf32>, vector<320x64xf32>, vector<34x64xf32> -> vector<34x64xf32>
    %c0_74 = arith.constant 0 : index
    %c0_75 = arith.constant 0 : index
    %153 = vector.load %arg6[%c0_74, %c0_75] : memref<1x64xf32, #tpu.memory_space<vmem>>, vector<1x64xf32>
    %154 = vector.broadcast %153 : vector<1x64xf32> to vector<34x64xf32>
    %155 = arith.mulf %152, %154 : vector<34x64xf32>
    %c0_76 = arith.constant 0 : index
    %c0_77 = arith.constant 0 : index
    %156 = vector.load %arg7[%c0_76, %c0_77] : memref<1x64xf32, #tpu.memory_space<vmem>>, vector<1x64xf32>
    %157 = vector.broadcast %156 : vector<1x64xf32> to vector<34x64xf32>
    %158 = arith.addf %155, %157 : vector<34x64xf32>
    %cst_78 = arith.constant 0.000000e+00 : f32
    %159 = vector.broadcast %cst_78 : f32 to vector<34x64xf32>
    %160 = arith.maximumf %158, %159 : vector<34x64xf32>
    %c0_79 = arith.constant 0 : index
    %c0_80 = arith.constant 0 : index
    %161 = vector.load %arg17[%c0_79, %c0_80] : memref<34x64xf32, #tpu.memory_space<vmem>>, vector<34x64xf32>
    tpu.vector_store %arg17[%c0_79, %c0_80], %160 {strides = array<i32>} : memref<34x64xf32, #tpu.memory_space<vmem>>, vector<34x64xf32>,
    %cst_81 = arith.constant 0.000000e+00 : f32
    %162 = vector.broadcast %cst_81 : f32 to vector<2x384xf32>
    %c0_82 = arith.constant 0 : index
    %c0_83 = arith.constant 0 : index
    %163 = tpu.strided_load %arg17[%c0_82, %c0_83] {strides = array<i32: 17, 1>} : memref<34x64xf32, #tpu.memory_space<vmem>>, vector<2x64xf32>
    %c1_84 = arith.constant 1 : index
    %c0_85 = arith.constant 0 : index
    %164 = tpu.strided_load %arg17[%c1_84, %c0_85] {strides = array<i32: 17, 1>} : memref<34x64xf32, #tpu.memory_space<vmem>>, vector<2x64xf32>
    %165 = arith.maximumf %163, %164 : vector<2x64xf32>
    %c0_86 = arith.constant 0 : index
    %c0_87 = arith.constant 0 : index
    %166 = vector.load %arg8[%c0_86, %c0_87] : memref<512x384xf32, #tpu.memory_space<vmem>>, vector<64x384xf32>
    %cst_88 = arith.constant dense<0.000000e+00> : vector<2x384xf32>
    %167 = tpu.matmul %165, %166, %cst_88 {dimension_numbers = #tpu.dot_dimension_numbers<[1], [0], [0], [1], [0, 0, 1, 1], [], []>} : vector<2x64xf32>, vector<64x384xf32>, vector<2x384xf32> -> vector<2x384xf32>
    %168 = arith.addf %162, %167 : vector<2x384xf32>
    %c2_89 = arith.constant 2 : index
    %c0_90 = arith.constant 0 : index
    %169 = tpu.strided_load %arg17[%c2_89, %c0_90] {strides = array<i32: 17, 1>} : memref<34x64xf32, #tpu.memory_space<vmem>>, vector<2x64xf32>
    %c3_91 = arith.constant 3 : index
    %c0_92 = arith.constant 0 : index
    %170 = tpu.strided_load %arg17[%c3_91, %c0_92] {strides = array<i32: 17, 1>} : memref<34x64xf32, #tpu.memory_space<vmem>>, vector<2x64xf32>
    %171 = arith.maximumf %169, %170 : vector<2x64xf32>
    %c64_93 = arith.constant 64 : index
    %c0_94 = arith.constant 0 : index
    %172 = vector.load %arg8[%c64_93, %c0_94] : memref<512x384xf32, #tpu.memory_space<vmem>>, vector<64x384xf32>
    %cst_95 = arith.constant dense<0.000000e+00> : vector<2x384xf32>
    %173 = tpu.matmul %171, %172, %cst_95 {dimension_numbers = #tpu.dot_dimension_numbers<[1], [0], [0], [1], [0, 0, 1, 1], [], []>} : vector<2x64xf32>, vector<64x384xf32>, vector<2x384xf32> -> vector<2x384xf32>
    %174 = arith.addf %168, %173 : vector<2x384xf32>
    %c4_96 = arith.constant 4 : index
    %c0_97 = arith.constant 0 : index
    %175 = tpu.strided_load %arg17[%c4_96, %c0_97] {strides = array<i32: 17, 1>} : memref<34x64xf32, #tpu.memory_space<vmem>>, vector<2x64xf32>
    %c5_98 = arith.constant 5 : index
    %c0_99 = arith.constant 0 : index
    %176 = tpu.strided_load %arg17[%c5_98, %c0_99] {strides = array<i32: 17, 1>} : memref<34x64xf32, #tpu.memory_space<vmem>>, vector<2x64xf32>
    %177 = arith.maximumf %175, %176 : vector<2x64xf32>
    %c128_100 = arith.constant 128 : index
    %c0_101 = arith.constant 0 : index
    %178 = vector.load %arg8[%c128_100, %c0_101] : memref<512x384xf32, #tpu.memory_space<vmem>>, vector<64x384xf32>
    %cst_102 = arith.constant dense<0.000000e+00> : vector<2x384xf32>
    %179 = tpu.matmul %177, %178, %cst_102 {dimension_numbers = #tpu.dot_dimension_numbers<[1], [0], [0], [1], [0, 0, 1, 1], [], []>} : vector<2x64xf32>, vector<64x384xf32>, vector<2x384xf32> -> vector<2x384xf32>
    %180 = arith.addf %174, %179 : vector<2x384xf32>
    %c6 = arith.constant 6 : index
    %c0_103 = arith.constant 0 : index
    %181 = tpu.strided_load %arg17[%c6, %c0_103] {strides = array<i32: 17, 1>} : memref<34x64xf32, #tpu.memory_space<vmem>>, vector<2x64xf32>
    %c7 = arith.constant 7 : index
    %c0_104 = arith.constant 0 : index
    %182 = tpu.strided_load %arg17[%c7, %c0_104] {strides = array<i32: 17, 1>} : memref<34x64xf32, #tpu.memory_space<vmem>>, vector<2x64xf32>
    %183 = arith.maximumf %181, %182 : vector<2x64xf32>
    %c192_105 = arith.constant 192 : index
    %c0_106 = arith.constant 0 : index
    %184 = vector.load %arg8[%c192_105, %c0_106] : memref<512x384xf32, #tpu.memory_space<vmem>>, vector<64x384xf32>
    %cst_107 = arith.constant dense<0.000000e+00> : vector<2x384xf32>
    %185 = tpu.matmul %183, %184, %cst_107 {dimension_numbers = #tpu.dot_dimension_numbers<[1], [0], [0], [1], [0, 0, 1, 1], [], []>} : vector<2x64xf32>, vector<64x384xf32>, vector<2x384xf32> -> vector<2x384xf32>
    %186 = arith.addf %180, %185 : vector<2x384xf32>
    %c8 = arith.constant 8 : index
    %c0_108 = arith.constant 0 : index
    %187 = tpu.strided_load %arg17[%c8, %c0_108] {strides = array<i32: 17, 1>} : memref<34x64xf32, #tpu.memory_space<vmem>>, vector<2x64xf32>
    %c9 = arith.constant 9 : index
    %c0_109 = arith.constant 0 : index
    %188 = tpu.strided_load %arg17[%c9, %c0_109] {strides = array<i32: 17, 1>} : memref<34x64xf32, #tpu.memory_space<vmem>>, vector<2x64xf32>
    %189 = arith.maximumf %187, %188 : vector<2x64xf32>
    %c256_110 = arith.constant 256 : index
    %c0_111 = arith.constant 0 : index
    %190 = vector.load %arg8[%c256_110, %c0_111] : memref<512x384xf32, #tpu.memory_space<vmem>>, vector<64x384xf32>
    %cst_112 = arith.constant dense<0.000000e+00> : vector<2x384xf32>
    %191 = tpu.matmul %189, %190, %cst_112 {dimension_numbers = #tpu.dot_dimension_numbers<[1], [0], [0], [1], [0, 0, 1, 1], [], []>} : vector<2x64xf32>, vector<64x384xf32>, vector<2x384xf32> -> vector<2x384xf32>
    %192 = arith.addf %186, %191 : vector<2x384xf32>
    %c10 = arith.constant 10 : index
    %c0_113 = arith.constant 0 : index
    %193 = tpu.strided_load %arg17[%c10, %c0_113] {strides = array<i32: 17, 1>} : memref<34x64xf32, #tpu.memory_space<vmem>>, vector<2x64xf32>
    %c11 = arith.constant 11 : index
    %c0_114 = arith.constant 0 : index
    %194 = tpu.strided_load %arg17[%c11, %c0_114] {strides = array<i32: 17, 1>} : memref<34x64xf32, #tpu.memory_space<vmem>>, vector<2x64xf32>
    %195 = arith.maximumf %193, %194 : vector<2x64xf32>
    %c320 = arith.constant 320 : index
    %c0_115 = arith.constant 0 : index
    %196 = vector.load %arg8[%c320, %c0_115] : memref<512x384xf32, #tpu.memory_space<vmem>>, vector<64x384xf32>
    %cst_116 = arith.constant dense<0.000000e+00> : vector<2x384xf32>
    %197 = tpu.matmul %195, %196, %cst_116 {dimension_numbers = #tpu.dot_dimension_numbers<[1], [0], [0], [1], [0, 0, 1, 1], [], []>} : vector<2x64xf32>, vector<64x384xf32>, vector<2x384xf32> -> vector<2x384xf32>
    %198 = arith.addf %192, %197 : vector<2x384xf32>
    %c12 = arith.constant 12 : index
    %c0_117 = arith.constant 0 : index
    %199 = tpu.strided_load %arg17[%c12, %c0_117] {strides = array<i32: 17, 1>} : memref<34x64xf32, #tpu.memory_space<vmem>>, vector<2x64xf32>
    %c13 = arith.constant 13 : index
    %c0_118 = arith.constant 0 : index
    %200 = tpu.strided_load %arg17[%c13, %c0_118] {strides = array<i32: 17, 1>} : memref<34x64xf32, #tpu.memory_space<vmem>>, vector<2x64xf32>
    %201 = arith.maximumf %199, %200 : vector<2x64xf32>
    %c384 = arith.constant 384 : index
    %c0_119 = arith.constant 0 : index
    %202 = vector.load %arg8[%c384, %c0_119] : memref<512x384xf32, #tpu.memory_space<vmem>>, vector<64x384xf32>
    %cst_120 = arith.constant dense<0.000000e+00> : vector<2x384xf32>
    %203 = tpu.matmul %201, %202, %cst_120 {dimension_numbers = #tpu.dot_dimension_numbers<[1], [0], [0], [1], [0, 0, 1, 1], [], []>} : vector<2x64xf32>, vector<64x384xf32>, vector<2x384xf32> -> vector<2x384xf32>
    %204 = arith.addf %198, %203 : vector<2x384xf32>
    %c14 = arith.constant 14 : index
    %c0_121 = arith.constant 0 : index
    %205 = tpu.strided_load %arg17[%c14, %c0_121] {strides = array<i32: 17, 1>} : memref<34x64xf32, #tpu.memory_space<vmem>>, vector<2x64xf32>
    %c15 = arith.constant 15 : index
    %c0_122 = arith.constant 0 : index
    %206 = tpu.strided_load %arg17[%c15, %c0_122] {strides = array<i32: 17, 1>} : memref<34x64xf32, #tpu.memory_space<vmem>>, vector<2x64xf32>
    %207 = arith.maximumf %205, %206 : vector<2x64xf32>
    %c448 = arith.constant 448 : index
    %c0_123 = arith.constant 0 : index
    %208 = vector.load %arg8[%c448, %c0_123] : memref<512x384xf32, #tpu.memory_space<vmem>>, vector<64x384xf32>
    %cst_124 = arith.constant dense<0.000000e+00> : vector<2x384xf32>
    %209 = tpu.matmul %207, %208, %cst_124 {dimension_numbers = #tpu.dot_dimension_numbers<[1], [0], [0], [1], [0, 0, 1, 1], [], []>} : vector<2x64xf32>, vector<64x384xf32>, vector<2x384xf32> -> vector<2x384xf32>
    %210 = arith.addf %204, %209 : vector<2x384xf32>
    %c0_125 = arith.constant 0 : index
    %c0_126 = arith.constant 0 : index
    %211 = vector.load %arg9[%c0_125, %c0_126] : memref<1x384xf32, #tpu.memory_space<vmem>>, vector<1x384xf32>
    %212 = vector.broadcast %211 : vector<1x384xf32> to vector<2x384xf32>
    %213 = arith.addf %210, %212 : vector<2x384xf32>
    %cst_127 = arith.constant 0.000000e+00 : f32
    %214 = vector.broadcast %cst_127 : f32 to vector<2x384xf32>
    %215 = arith.maximumf %213, %214 : vector<2x384xf32>
    %c0_128 = arith.constant 0 : index
    %c0_129 = arith.constant 0 : index
    %216 = vector.load %arg10[%c0_128, %c0_129] : memref<384x256xf32, #tpu.memory_space<vmem>>, vector<384x256xf32>
    %cst_130 = arith.constant dense<0.000000e+00> : vector<2x256xf32>
    %217 = tpu.matmul %215, %216, %cst_130 {dimension_numbers = #tpu.dot_dimension_numbers<[1], [0], [0], [1], [0, 0, 1, 1], [], []>} : vector<2x384xf32>, vector<384x256xf32>, vector<2x256xf32> -> vector<2x256xf32>
    %c0_131 = arith.constant 0 : index
    %c0_132 = arith.constant 0 : index
    %218 = vector.load %arg11[%c0_131, %c0_132] : memref<1x256xf32, #tpu.memory_space<vmem>>, vector<1x256xf32>
    %219 = vector.broadcast %218 : vector<1x256xf32> to vector<2x256xf32>
    %220 = arith.addf %217, %219 : vector<2x256xf32>
    %cst_133 = arith.constant 0.000000e+00 : f32
    %221 = vector.broadcast %cst_133 : f32 to vector<2x256xf32>
    %222 = arith.maximumf %220, %221 : vector<2x256xf32>
    %c0_134 = arith.constant 0 : index
    %c0_135 = arith.constant 0 : index
    %223 = vector.load %arg12[%c0_134, %c0_135] : memref<256x1xf32, #tpu.memory_space<vmem>>, vector<256x1xf32>
    %cst_136 = arith.constant dense<0.000000e+00> : vector<2x1xf32>
    %224 = tpu.matmul %222, %223, %cst_136 {dimension_numbers = #tpu.dot_dimension_numbers<[1], [0], [0], [1], [0, 0, 1, 1], [], []>} : vector<2x256xf32>, vector<256x1xf32>, vector<2x1xf32> -> vector<2x1xf32>
    %c0_137 = arith.constant 0 : index
    %c0_138 = arith.constant 0 : index
    %225 = vector.load %arg13[%c0_137, %c0_138] : memref<1x1xf32, #tpu.memory_space<vmem>>, vector<1x1xf32>
    %226 = vector.broadcast %225 : vector<1x1xf32> to vector<2x1xf32>
    %227 = arith.addf %224, %226 : vector<2x1xf32>
    %c0_139 = arith.constant 0 : index
    %c0_140 = arith.constant 0 : index
    %228 = vector.load %arg14[%c0_139, %c0_140] : memref<2x1xf32, #tpu.memory_space<vmem>>, vector<2x1xf32>
    tpu.vector_store %arg14[%c0_139, %c0_140], %227 {strides = array<i32>} : memref<2x1xf32, #tpu.memory_space<vmem>>, vector<2x1xf32>,
    return
  }
  func.func @transform_0(%arg0: i32) -> (i32, i32, i32) {
    %c0_i32 = arith.constant 0 : i32
    %c0_i32_0 = arith.constant 0 : i32
    %c0_i32_1 = arith.constant 0 : i32
    return %arg0, %c0_i32, %c0_i32_0 : i32, i32, i32
  }
  func.func @transform_1(%arg0: i32) -> (i32, i32) {
    %c0_i32 = arith.constant 0 : i32
    %c0_i32_0 = arith.constant 0 : i32
    %c0_i32_1 = arith.constant 0 : i32
    return %c0_i32, %c0_i32_0 : i32, i32
  }
  func.func @transform_2(%arg0: i32) -> (i32, i32) {
    %c0_i32 = arith.constant 0 : i32
    %c0_i32_0 = arith.constant 0 : i32
    %c0_i32_1 = arith.constant 0 : i32
    return %c0_i32, %c0_i32_0 : i32, i32
  }
  func.func @transform_3(%arg0: i32) -> (i32, i32) {
    %c0_i32 = arith.constant 0 : i32
    %c0_i32_0 = arith.constant 0 : i32
    %c0_i32_1 = arith.constant 0 : i32
    return %c0_i32, %c0_i32_0 : i32, i32
  }
  func.func @transform_4(%arg0: i32) -> (i32, i32) {
    %c0_i32 = arith.constant 0 : i32
    %c0_i32_0 = arith.constant 0 : i32
    %c0_i32_1 = arith.constant 0 : i32
    return %c0_i32, %c0_i32_0 : i32, i32
  }
  func.func @transform_5(%arg0: i32) -> (i32, i32) {
    %c0_i32 = arith.constant 0 : i32
    %c0_i32_0 = arith.constant 0 : i32
    %c0_i32_1 = arith.constant 0 : i32
    return %c0_i32, %c0_i32_0 : i32, i32
  }
  func.func @transform_6(%arg0: i32) -> (i32, i32) {
    %c0_i32 = arith.constant 0 : i32
    %c0_i32_0 = arith.constant 0 : i32
    %c0_i32_1 = arith.constant 0 : i32
    return %c0_i32, %c0_i32_0 : i32, i32
  }
  func.func @transform_7(%arg0: i32) -> (i32, i32) {
    %c0_i32 = arith.constant 0 : i32
    %c0_i32_0 = arith.constant 0 : i32
    %c0_i32_1 = arith.constant 0 : i32
    return %c0_i32, %c0_i32_0 : i32, i32
  }
  func.func @transform_8(%arg0: i32) -> (i32, i32) {
    %c0_i32 = arith.constant 0 : i32
    %c0_i32_0 = arith.constant 0 : i32
    %c0_i32_1 = arith.constant 0 : i32
    return %c0_i32, %c0_i32_0 : i32, i32
  }
  func.func @transform_9(%arg0: i32) -> (i32, i32) {
    %c0_i32 = arith.constant 0 : i32
    %c0_i32_0 = arith.constant 0 : i32
    %c0_i32_1 = arith.constant 0 : i32
    return %c0_i32, %c0_i32_0 : i32, i32
  }
  func.func @transform_10(%arg0: i32) -> (i32, i32) {
    %c0_i32 = arith.constant 0 : i32
    %c0_i32_0 = arith.constant 0 : i32
    %c0_i32_1 = arith.constant 0 : i32
    return %c0_i32, %c0_i32_0 : i32, i32
  }
  func.func @transform_11(%arg0: i32) -> (i32, i32) {
    %c0_i32 = arith.constant 0 : i32
    %c0_i32_0 = arith.constant 0 : i32
    %c0_i32_1 = arith.constant 0 : i32
    return %c0_i32, %c0_i32_0 : i32, i32
  }
  func.func @transform_12(%arg0: i32) -> (i32, i32) {
    %c0_i32 = arith.constant 0 : i32
    %c0_i32_0 = arith.constant 0 : i32
    %c0_i32_1 = arith.constant 0 : i32
    return %c0_i32, %c0_i32_0 : i32, i32
  }
  func.func @transform_13(%arg0: i32) -> (i32, i32) {
    %c0_i32 = arith.constant 0 : i32
    %c0_i32_0 = arith.constant 0 : i32
    return %arg0, %c0_i32 : i32, i32
  }
}

</mosaic_0001>

<bundles_post_ra>
// kernel: cnn1d_forward.1
= control target key start
LH: loop header
LB: loop body
LE: loop exit
PB: predicated region body
PF: predicated region fallthrough
CT: control target
= control target key end

     0   :  { %s4223_s0 = inlined_call_operand.vmem [shape: f32[2,16,1], index: 0, kind: input, shape index: {}]   ;;  %s4224_s1 = inlined_call_operand.vmem [shape: f32[5,64], index: 1, kind: input, shape index: {}]   ;;  %s4225_s2 = inlined_call_operand.vmem [shape: f32[1,64], index: 2, kind: input, shape index: {}]   ;;  %s4226_s3 = inlined_call_operand.vmem [shape: f32[1,64], index: 3, kind: input, shape index: {}]   ;;  %s4227_s4 = inlined_call_operand.vmem [shape: f32[320,64], index: 4, kind: input, shape index: {}]   ;;  %s4228_s5 = inlined_call_operand.vmem [shape: f32[1,64], index: 5, kind: input, shape index: {}]   ;;  %s4229_s6 = inlined_call_operand.vmem [shape: f32[1,64], index: 6, kind: input, shape index: {}]   ;;  %s4230_s7 = inlined_call_operand.hbm [shape: f32[512,384], index: 7, kind: input, shape index: {}]   ;;  %s4231_s8 = inlined_call_operand.vmem [shape: f32[1,384], index: 8, kind: input, shape index: {}]   ;;  %s4232_s9 = inlined_call_operand.vmem [shape: f32[384,256], index: 9, kind: input, shape index: {}]   ;;  %s4233_s10 = inlined_call_operand.vmem [shape: f32[1,256], index: 10, kind: input, shape index: {}]   ;;  %s4234_s11 = inlined_call_operand.vmem [shape: f32[256,1], index: 11, kind: input, shape index: {}]   ;;  %s4235_s12 = inlined_call_operand.<no memory space> [shape: f32[1,1], index: 12, kind: input, shape index: {}]   ;;  %s4236_s13 = inlined_call_operand.vmem [shape: f32[2,1], index: 13, kind: output, shape index: {}]  }
   0x1   :  { %v18_v0 = vstv %s4235_s12 }
   0x2   :  { %19 = vst [vmem:[#allocation5] sm:$0x1] %v18_v0 }
   0x3   :  { %20 = vsyncpa [#allocation7], 0  ;;  %s3322_s27 = smov [#allocation6]   ;;  %s3298_s14 = scalar_lea.hbm %s4230_s7, 24576 }
   0x4   :  { %s40_s28 = sshll.u32 %s3322_s27, 4  ;;  %p3299_p0 = scmp.ne.s32.totalorder %s4230_s7, %s3298_s14  ;;  %s41_s28 = int_to_ptr.vmem [resolvable:$true] %s40_s28 }
   0x5   :  { %p3302_p1 = scmp.lt.u32.totalorder %s3298_s14, %s4230_s7 }
   0x7   :  { %p3304_p2 = pnand %p3302_p1, %p3299_p0 }
   0x9   :  { %3307 = shalt.err (!%p3304_p2)
}
   0xa   :  { %s3308_s12 = scalar_lea.vmem %s41_s28, 24576  ;;  %p3313_p4 = scmp.lt.s32.totalorder %s41_s28, %s41_s28 }
   0xb   :  { %p3309_p3 = scmp.ne.s32.totalorder %s41_s28, %s3308_s12  ;;  %p3314_p5 = scmp.lt.s32.totalorder %s3308_s12, %s3308_s12 }
   0xd   :  { %p3315_p6 = por %p3314_p5, %p3313_p4 }
   0xf   :  { %p3316_p7 = pnand %p3315_p6, %p3309_p3 }
  0x11   :  { %3319 = shalt.err (!%p3316_p7)
}
  0x12   :  { %s3323_s19 = smov 384   ;;  %s3324_s20 = smov 24  }
  0x13   :  { %46 = dma.hbm_to_vmem [thread:$0]  %s4230_s7, 24576, %s41_s28, [#allocation7], %s3323_s19, %s3323_s19, %s3324_s20  }
  0x14   :  { %3320 = dma.done.wait [#allocation7], 24576  }
  0x15   :  { %3321 = vsyncadd [#allocation7], 4294942720  ;;  %vm60_vm0 = vcmask 523264   ;;  %v3325_v1 = vmov 0   ;;  %v3326_v2 = vmov 0.0   ;;  %v2498_v3 = vld [vmem:[%s4223_s0 + $0x10] sm:$0xff]  ;;  %v105_v43 = vlaneseq }
  0x16   :  { %3297 = vset.pattern.permute.xlu1 %v3325_v1  ;;  %3296 = vset.pattern.permute.xlu0 %v3325_v1  ;;  %64 = vst.msk [vmem:[#allocation2 + $0x18] sm:$0xff] %vm60_vm0, %v3326_v2  ;;  %65 = vst.msk [vmem:[#allocation2 + $0x20] sm:$0xff] %vm60_vm0, %v3326_v2  ;;  %v88_v4 = vld [vmem:[%s4223_s0] sm:$0xff]  ;;  %v2499_v5 = vld [vmem:[%s4223_s0 + $0x18] sm:$0xff]  ;;  %vm67_vm1 = vcmask 519168   ;;  %vm266_vm2 = vcmask 523265  }
  0x17   :  { %61 = vst.msk [vmem:[#allocation2] sm:$0xff] %vm60_vm0, %v3326_v2  ;;  %62 = vst.msk [vmem:[#allocation2 + $0x8] sm:$0xff] %vm60_vm0, %v3326_v2  ;;  %828 = vmatprep.mubr.f32.mxu1 %v3326_v2  ;;  %274 = vperm.xlu1 %3297, %v2498_v3   ;;  %v89_v6 = vld [vmem:[%s4223_s0 + $0x8] sm:$0xff]  ;;  %v451_v7 = vld [vmem:[%s4227_s4 + $0x80] sm:$0xff]  ;;  %v3534_v46 = vshrl.u32 %v105_v43, 7  ;;  %vm242_vm3 = vcmask 523267  }
  0x18   :  { %63 = vst.msk [vmem:[#allocation2 + $0x10] sm:$0xff] %vm60_vm0, %v3326_v2  ;;  %66 = vst.msk [vmem:[#allocation2 + $0x28] sm:$0xff] %vm60_vm0, %v3326_v2  ;;  %92 = vperm.xlu0 %3296, %v88_v4   ;;  %v452_v8 = vld [vmem:[%s4227_s4 + $0x88] sm:$0xff]  ;;  %v435_v9 = vld [vmem:[%s4227_s4] sm:$0xff]  ;;  %vm219_vm4 = vcmask 523269   ;;  %vm246_vm5 = vcmask 1041408  }
  0x19   :  { %69 = vst [vmem:[#allocation3] sm:$0xff] %v3326_v2  ;;  %70 = vst [vmem:[#allocation3 + $0x8] sm:$0xff] %v3326_v2  ;;  %v2874_v10 = vpack.c.bf16 %v452_v8, %v451_v7  ;;  %v436_v11 = vld [vmem:[%s4227_s4 + $0x8] sm:$0xff]  ;;  %v453_v12 = vld [vmem:[%s4227_s4 + $0x90] sm:$0xff]  ;;  %v3539_v49 = vsub.s32 0, %v3534_v46  ;;  %v3545_v51 = vsub.s32 1, %v3534_v46 }
  0x1a   :  { %71 = vst.msk [vmem:[#allocation3 + $0x10] sm:$0xff] %vm60_vm0, %v3326_v2  ;;  %72 = vst [vmem:[#allocation3 + $0x18] sm:$0xff] %v3326_v2  ;;  %v454_v13 = vld [vmem:[%s4227_s4 + $0x98] sm:$0xff]  ;;  %v2876_v14 = vpack.c.bf16 %v436_v11, %v435_v9  ;;  %v437_v16 = vld [vmem:[%s4227_s4 + $0x10] sm:$0xff]  ;;  %v171_v52 = vsub.s32 4, %v3534_v46  ;;  %v139_v53 = vsub.s32 2, %v3534_v46 }
  0x1b   :  { %73 = vst [vmem:[#allocation3 + $0x20] sm:$0xff] %v3326_v2  ;;  %74 = vst.msk [vmem:[#allocation3 + $0x28] sm:$0xff] %vm60_vm0, %v3326_v2  ;;  %279 = vperm.xlu1 %3297, %v2499_v5   ;;  %v2878_v15 = vpack.c.bf16 %v454_v13, %v453_v12  ;;  %v438_v17 = vld [vmem:[%s4227_s4 + $0x18] sm:$0xff]  ;;  %v455_v18 = vld [vmem:[%s4227_s4 + $0xa0] sm:$0xff]  ;;  %2875 = vmatprep.subr.bf16.mxu0 %v2874_v10  ;;  %v155_v54 = vsub.s32 3, %v3534_v46  ;;  %vm260_vm6 = vcmask 1040384  }
  0x1c   :  { %75 = vst [vmem:[#allocation3 + $0x30] sm:$0xff] %v3326_v2  ;;  %76 = vst [vmem:[#allocation3 + $0x38] sm:$0xff] %v3326_v2  ;;  %97 = vperm.xlu0 %3296, %v89_v6   ;;  %v456_v19 = vld [vmem:[%s4227_s4 + $0xa8] sm:$0xff]  ;;  %2877 = vmatpush3.bf16.msra.mxu0 %v2876_v14  ;;  %v2880_v20 = vpack.c.bf16 %v438_v17, %v437_v16  ;;  %v439_v22 = vld [vmem:[%s4227_s4 + $0x20] sm:$0xff]  ;;  %vm222_vm7 = vcmask 1043456   ;;  %vm236_vm8 = vcmask 1042432  }
  0x1d   :  { %77 = vst.msk [vmem:[#allocation3 + $0x40] sm:$0xff] %vm60_vm0, %v3326_v2  ;;  %78 = vst [vmem:[#allocation3 + $0x48] sm:$0xff] %v3326_v2  ;;  %2879 = vmatprep.subr.bf16.mxu0 %v2878_v15  ;;  %v2882_v21 = vpack.c.bf16 %v456_v19, %v455_v18  ;;  %v440_v23 = vld [vmem:[%s4227_s4 + $0x28] sm:$0xff]  ;;  %v457_v24 = vld [vmem:[%s4227_s4 + $0xb0] sm:$0xff]  ;;  %vm213_vm9 = vcmask 1044480   ;;  %vm244_vm10 = vcmask 521216  }
  0x1e   :  { %79 = vst [vmem:[#allocation3 + $0x50] sm:$0xff] %v3326_v2  ;;  %80 = vst.msk [vmem:[#allocation3 + $0x58] sm:$0xff] %vm60_vm0, %v3326_v2  ;;  %v458_v25 = vld [vmem:[%s4227_s4 + $0xb8] sm:$0xff]  ;;  %v2884_v26 = vpack.c.bf16 %v440_v23, %v439_v22  ;;  %v441_v28 = vld [vmem:[%s4227_s4 + $0x30] sm:$0xff]  ;;  %vm416_vm11 = vcmask 523266   ;;  %vm418_vm12 = vcmask 520192  }
  0x1f   :  { %81 = vst [vmem:[#allocation3 + $0x60] sm:$0x3] %v3326_v2  ;;  %82 = vst [vmem:[#allocation3 + $0x68] sm:$0x3] %v3326_v2  ;;  %v2886_v27 = vpack.c.bf16 %v458_v25, %v457_v24  ;;  %v442_v29 = vld [vmem:[%s4227_s4 + $0x38] sm:$0xff]  ;;  %v459_v30 = vld [vmem:[%s4227_s4 + $0xc0] sm:$0xff] }
  0x20   :  { %68 = vst.msk [vmem:[#allocation2 + $0x30] sm:$0xf] %vm67_vm1, %v3326_v2  ;;  %2881 = vmatpush3.bf16.msra.mxu0 %v2880_v20  ;;  %v460_v31 = vld [vmem:[%s4227_s4 + $0xc8] sm:$0xff]  ;;  %v2888_v32 = vpack.c.bf16 %v442_v29, %v441_v28  ;;  %v443_v34 = vld [vmem:[%s4227_s4 + $0x40] sm:$0xff]  ;;  %v461_v36 = vld [vmem:[%s4227_s4 + $0xd0] sm:$0xff]  ;;  %vm394_vm13 = vcmask 523268  }
  0x21   :  { %2883 = vmatprep.subr.bf16.mxu0 %v2882_v21  ;;  %v2890_v33 = vpack.c.bf16 %v460_v31, %v459_v30  ;;  %v444_v35 = vld [vmem:[%s4227_s4 + $0x48] sm:$0xff]  ;;  %v462_v37 = vld [vmem:[%s4227_s4 + $0xd8] sm:$0xff]  ;;  %v445_v40 = vld [vmem:[%s4227_s4 + $0x50] sm:$0xff]  ;;  %vm371_vm14 = vcmask 523270   ;;  %vm396_vm15 = vcmask 522240  }
  0x22   :  { %v2892_v38 = vpack.c.bf16 %v444_v35, %v443_v34  ;;  %v2894_v39 = vpack.c.bf16 %v462_v37, %v461_v36  ;;  %v446_v41 = vld [vmem:[%s4227_s4 + $0x58] sm:$0xff]  ;;  %v85_v50 = vld [vmem:[%s4224_s1] sm:$0x1f] }
  0x23   :  { %v2896_v42 = vpack.c.bf16 %v446_v41, %v445_v40  ;;  %v108_v55 = vrot.slane %v85_v50, %v3539_v49  ;;  %v3552_v56 = vrot.slane %v85_v50, %v3545_v51  ;;  %v180_v57 = vld [vmem:[#allocation2 + $0x15] ss:$2 sm:$0x7]  ;;  %v3554_v59 = vrot.slane %v85_v50, %v171_v52  ;;  %v2392_v46 = vld [vmem:[%s4234_s11 + $0x60] sm:$0xff] }
  0x24   :  { %2885 = vmatpush3.bf16.msra.mxu0 %v2884_v26  ;;  %v3558_v62 = vrot.slane %v85_v50, %v139_v53  ;;  %v3560_v63 = vrot.slane %v85_v50, %v155_v54 }
  0x25   :  { %2887 = vmatprep.subr.bf16.mxu0 %v2886_v27  ;;  %v3563_v3 = vmul.f32 %v180_v57, %v3554_v59  ;;  %v3588_v57 = vld [vmem:[%s4225_s2] ss:$0 sm:$0xff]  ;;  %s3327_s2 = smov 64  }
  0x27   :  { %v343_v58 = vld [vmem:[#allocation2 + $0x2f] ss:$2 sm:$0x7] }
  0x28   :  { %2889 = vmatpush3.bf16.msra.mxu0 %v2888_v32  ;;  %v3566_v6 = vmul.f32 %v343_v58, %v3554_v59 }
  0x29   :  { %2891 = vmatprep.subr.bf16.mxu0 %v2890_v33 }
  0x2c   :  { %2893 = vmatpush3.bf16.msra.mxu0 %v2892_v38 }
  0x2d   :  { %2895 = vmatprep.subr.bf16.mxu0 %v2894_v39 }
  0x30   :  { %2897 = vmatpush3.bf16.msra.mxu0 %v2896_v42 }
  0x96   :  { %v275_v44 = vpop.permute.xlu1 %274 }
  0x97   :  { %v93_v45 = vpop.permute.xlu0 %92  ;;  %282 = vst.msk [vmem:[#allocation2 + $0x1f] sm:$0xff] %vm60_vm0, %v275_v44 }
  0x98   :  { %100 = vst.msk [vmem:[#allocation2 + $0x5] sm:$0xff] %vm60_vm0, %v93_v45 }
  0x9a   :  { %v280_v47 = vpop.permute.xlu1 %279 }
  0x9b   :  { %v98_v48 = vpop.permute.xlu0 %97  ;;  %283 = vst.msk [vmem:[#allocation2 + $0x27] sm:$0xff] %vm60_vm0, %v280_v47 }
  0x9c   :  { %101 = vst.msk [vmem:[#allocation2 + $0xd] sm:$0xff] %vm60_vm0, %v98_v48 }
  0xa2   :  { %v285_v60 = vld [vmem:[#allocation2 + $0x1a] ss:$2 sm:$0xff]  ;;  %v287_v61 = vld [vmem:[#allocation2 + $0x2a] ss:$2 sm:$0x7] }
  0xa3   :  { %v293_v0 = vld [vmem:[#allocation2 + $0x1b] ss:$2 sm:$0xff]  ;;  %v295_v1 = vld [vmem:[#allocation2 + $0x2b] ss:$2 sm:$0x7]  ;;  %v288_v4 = vmul.f32 %v285_v60, %v108_v55  ;;  %v289_v5 = vmul.f32 %v287_v61, %v108_v55 }
  0xa4   :  { %v102_v7 = vld [vmem:[#allocation2] ss:$2 sm:$0xff]  ;;  %v114_v8 = vld [vmem:[#allocation2 + $0x1] ss:$2 sm:$0xff]  ;;  %v296_v10 = vmul.f32 %v293_v0, %v108_v55  ;;  %v297_v11 = vmul.f32 %v295_v1, %v108_v55  ;;  %v300_v12 = vmul.f32 %v293_v0, %v3552_v56  ;;  %v301_v13 = vmul.f32 %v295_v1, %v3552_v56 }
  0xa5   :  { %v130_v9 = vld [vmem:[#allocation2 + $0x2] ss:$2 sm:$0xff]  ;;  %v109_v14 = vmul.f32 %v108_v55, %v102_v7  ;;  %v117_v15 = vmul.f32 %v114_v8, %v108_v55  ;;  %v125_v16 = vmul.f32 %v3552_v56, %v114_v8  ;;  %v146_v18 = vld [vmem:[#allocation2 + $0x3] ss:$2 sm:$0xff] }
  0xa6   :  { %v133_v17 = vmul.f32 %v130_v9, %v3552_v56  ;;  %v162_v19 = vld [vmem:[#allocation2 + $0x4] ss:$2 sm:$0xff]  ;;  %v178_v20 = vld [vmem:[#allocation2 + $0x5] ss:$2 sm:$0xff]  ;;  %v141_v21 = vmul.f32 %v3558_v62, %v130_v9  ;;  %v149_v22 = vmul.f32 %v146_v18, %v3558_v62  ;;  %v157_v23 = vmul.f32 %v3560_v63, %v146_v18 }
  0xa7   :  { %v165_v24 = vmul.f32 %v162_v19, %v3560_v63  ;;  %v104_v25 = vld [vmem:[#allocation2 + $0x10] ss:$2 sm:$0x7]  ;;  %v116_v26 = vld [vmem:[#allocation2 + $0x11] ss:$2 sm:$0x7]  ;;  %v127_v27 = vadd.f32 %v125_v16, %v109_v14  ;;  %v173_v29 = vmul.f32 %v3554_v59, %v162_v19  ;;  %v181_v30 = vmul.f32 %v178_v20, %v3554_v59 }
  0xa8   :  { %v135_v28 = vadd.f32 %v133_v17, %v117_v15  ;;  %v132_v31 = vld [vmem:[#allocation2 + $0x12] ss:$2 sm:$0x7]  ;;  %v148_v32 = vld [vmem:[#allocation2 + $0x13] ss:$2 sm:$0x7]  ;;  %v110_v33 = vmul.f32 %v108_v55, %v104_v25  ;;  %v118_v34 = vmul.f32 %v116_v26, %v108_v55  ;;  %v126_v35 = vmul.f32 %v3552_v56, %v116_v26 }
  0xa9   :  { %v134_v36 = vmul.f32 %v132_v31, %v3552_v56  ;;  %v164_v37 = vld [vmem:[#allocation2 + $0x14] ss:$2 sm:$0x7]  ;;  %v143_v38 = vadd.f32 %v141_v21, %v127_v27  ;;  %v142_v40 = vmul.f32 %v3558_v62, %v132_v31  ;;  %v150_v41 = vmul.f32 %v148_v32, %v3558_v62  ;;  %v305_v42 = vld [vmem:[#allocation2 + $0x1c] ss:$2 sm:$0xff] }
  0xaa   :  { %v151_v39 = vadd.f32 %v149_v22, %v135_v28  ;;  %v128_v43 = vadd.f32 %v126_v35, %v110_v33  ;;  %v158_v45 = vmul.f32 %v3560_v63, %v148_v32  ;;  %v166_v47 = vmul.f32 %v164_v37, %v3560_v63  ;;  %v307_v48 = vld [vmem:[#allocation2 + $0x2c] ss:$2 sm:$0x7]  ;;  %v317_v14 = vld [vmem:[#allocation2 + $0x1d] ss:$2 sm:$0xff] }
  0xab   :  { %v136_v44 = vadd.f32 %v134_v36, %v118_v34  ;;  %v159_v50 = vadd.f32 %v157_v23, %v143_v38  ;;  %v174_v54 = vmul.f32 %v3554_v59, %v164_v37  ;;  %v302_v55 = vadd.f32 %v300_v12, %v288_v4  ;;  %v3596_v4 = vld [vmem:[%s4226_s3] ss:$0 sm:$0xff]  ;;  %v341_v35 = vld [vmem:[#allocation2 + $0x1f] ss:$2 sm:$0xff] }
  0xac   :  { %v167_v52 = vadd.f32 %v165_v24, %v151_v39  ;;  %v144_v58 = vadd.f32 %v142_v40, %v128_v43  ;;  %v303_v61 = vadd.f32 %v301_v13, %v289_v5  ;;  %v308_v0 = vmul.f32 %v305_v42, %v3552_v56  ;;  %v319_v13 = vld [vmem:[#allocation2 + $0x2d] ss:$2 sm:$0x7] }
  0xad   :  { %v152_v60 = vadd.f32 %v150_v41, %v136_v44  ;;  %v175_v1 = vadd.f32 %v173_v29, %v159_v50  ;;  %v309_v8 = vmul.f32 %v307_v48, %v3552_v56  ;;  %v312_v9 = vmul.f32 %v305_v42, %v3558_v62 }
  0xae   :  { %v183_v7 = vadd.f32 %v181_v30, %v167_v52  ;;  %v160_v12 = vadd.f32 %v158_v45, %v144_v58  ;;  %v310_v16 = vadd.f32 %v308_v0, %v296_v10  ;;  %v313_v5 = vmul.f32 %v307_v48, %v3558_v62  ;;  %v331_v30 = vld [vmem:[#allocation2 + $0x2e] ss:$2 sm:$0x7] }
  0xaf   :  { %v168_v15 = vadd.f32 %v166_v47, %v152_v60  ;;  %v191_v17 = vmul.f32 %v3588_v57, %v175_v1  ;;  %v311_v56 = vadd.f32 %v309_v8, %v297_v11  ;;  %v314_v19 = vadd.f32 %v312_v9, %v302_v55  ;;  %v329_v11 = vld [vmem:[#allocation2 + $0x1e] ss:$2 sm:$0xff] }
  0xb0   :  { %v203_v18 = vmul.f32 %v3588_v57, %v183_v7  ;;  %v176_v20 = vadd.f32 %v174_v54, %v160_v12  ;;  %v315_v22 = vadd.f32 %v313_v5, %v303_v61  ;;  %v320_v23 = vmul.f32 %v317_v14, %v3558_v62  ;;  %v464_v5 = vld [vmem:[%s4227_s4 + $0xe8] sm:$0xff] }
  0xb1   :  { %v184_v21 = vadd.f32 %v3563_v3, %v168_v15  ;;  %v199_v24 = vadd.f32 %v3596_v4, %v191_v17  ;;  %v321_v25 = vmul.f32 %v319_v13, %v3558_v62  ;;  %v324_v26 = vmul.f32 %v317_v14, %v3560_v63 }
  0xb2   :  { %v205_v10 = vadd.f32 %v3596_v4, %v203_v18  ;;  %v192_v27 = vmul.f32 %v3588_v57, %v176_v20  ;;  %v322_v28 = vadd.f32 %v320_v23, %v310_v16  ;;  %v325_v29 = vmul.f32 %v319_v13, %v3560_v63 }
  0xb3   :  { %v204_v3 = vmul.f32 %v3588_v57, %v184_v21  ;;  %v201_v31 = vmax.f32 %v199_v24, 0.0  ;;  %v323_v33 = vadd.f32 %v321_v25, %v311_v56  ;;  %v326_v34 = vadd.f32 %v324_v26, %v314_v19  ;;  %v447_v56 = vld [vmem:[%s4227_s4 + $0x60] sm:$0xff]  ;;  %v448_v19 = vld [vmem:[%s4227_s4 + $0x68] sm:$0xff]  ;;  %v465_v24 = vld [vmem:[%s4227_s4 + $0xf0] sm:$0xff] }
  0xb4   :  { %v207_v32 = vmax.f32 %v205_v10, 0.0  ;;  %v200_v62 = vadd.f32 %v3596_v4, %v192_v27  ;;  %v327_v37 = vadd.f32 %v325_v29, %v315_v22  ;;  %v332_v38 = vmul.f32 %v329_v11, %v3560_v63  ;;  %v466_v10 = vld [vmem:[%s4227_s4 + $0xf8] sm:$0xff]  ;;  %v449_v27 = vld [vmem:[%s4227_s4 + $0x70] sm:$0xff] }
  0xb5   :  { %v206_v36 = vadd.f32 %v3596_v4, %v204_v3  ;;  %v333_v40 = vmul.f32 %v331_v30, %v3560_v63  ;;  %v336_v41 = vmul.f32 %v329_v11, %v3554_v59  ;;  %v337_v42 = vmul.f32 %v331_v30, %v3554_v59  ;;  %v450_v3 = vld [vmem:[%s4227_s4 + $0x78] sm:$0xff] }
  0xb6   :  { %v3613_v39 = vmax.f32 %v201_v31, %v207_v32  ;;  %v202_v43 = vmax.f32 %v200_v62, 0.0  ;;  %v334_v45 = vadd.f32 %v332_v38, %v322_v28  ;;  %v344_v47 = vmul.f32 %v341_v35, %v3554_v59 }
  0xb7   :  { %v208_v44 = vmax.f32 %v206_v36, 0.0  ;;  %v335_v54 = vadd.f32 %v333_v40, %v323_v33  ;;  %v338_v58 = vadd.f32 %v336_v41, %v326_v34  ;;  %v339_v63 = vadd.f32 %v337_v42, %v327_v37 }
  0xb8   :  { %v247_v48 = vrot.slane %v3613_v39, 6  ;;  %v261_v50 = vrot.slane %v3613_v39, 7  ;;  %v223_v52 = vrot.slane %v3613_v39, 4  ;;  %v346_v60 = vadd.f32 %v344_v47, %v334_v45 }
  0xb9   :  { %v210_v55 = vmax.f32 %v202_v43, %v208_v44  ;;  %v347_v59 = vadd.f32 %v3566_v6, %v335_v54  ;;  %v237_v61 = vrot.slane %v3613_v39, 5  ;;  %v214_v0 = vrot.slane %v3613_v39, 3  ;;  %v463_v6 = vld [vmem:[%s4227_s4 + $0xe0] sm:$0xff] }
  0xba   :  { %267 = vst.msk [vmem:[#allocation3 + $0x10] sm:$0xfe] %vm266_vm2, %v261_v50  ;;  %250 = vrot.lane.b32.xlu0 %v247_v48, %s3327_s2  ;;  %226 = vrot.lane.b32.xlu1 %v223_v52, %s3327_s2  ;;  %v348_v8 = vmul.f32 %v3588_v57, %v338_v58  ;;  %v349_v9 = vmul.f32 %v3588_v57, %v339_v63  ;;  %vm374_vm2 = vcmask 516096  }
  0xbb   :  { %v248_v1 = vrot.slane %v210_v55, 6  ;;  %v262_v7 = vrot.slane %v210_v55, 7  ;;  %v354_v14 = vmul.f32 %v3588_v57, %v346_v60  ;;  %v355_v12 = vmul.f32 %v3588_v57, %v347_v59  ;;  %243 = vst.msk [vmem:[#allocation3 + $0x8] sm:$0xf8] %vm242_vm3, %v237_v61  ;;  %v467_v60 = vld [vmem:[%s4227_s4 + $0x100] sm:$0xff]  ;;  %v468_v59 = vld [vmem:[%s4227_s4 + $0x108] sm:$0xff] }
  0xbc   :  { %v224_v15 = vrot.slane %v210_v55, 4  ;;  %v238_v16 = vrot.slane %v210_v55, 5  ;;  %220 = vst.msk [vmem:[#allocation3] sm:$0xe0] %vm219_vm4, %v214_v0  ;;  %v350_v57 = vadd.f32 %v3596_v4, %v348_v8  ;;  %v351_v18 = vadd.f32 %v3596_v4, %v349_v9  ;;  %v470_v9 = vld [vmem:[%s4227_s4 + $0x118] sm:$0xff] }
  0xbd   :  { %v249_v13 = vsel %vm246_vm5, %v247_v48, %v248_v1  ;;  %v263_v17 = vsel %vm260_vm6, %v261_v50, %v262_v7  ;;  %v356_v20 = vadd.f32 %v3596_v4, %v354_v14  ;;  %v357_v21 = vadd.f32 %v3596_v4, %v355_v12  ;;  %v469_v1 = vld [vmem:[%s4227_s4 + $0x110] sm:$0xff] }
  0xbe   :  { %252 = vrot.lane.b32.xlu0 %v249_v13, %s3327_s2  ;;  %268 = vst.msk [vmem:[#allocation3 + $0x28] sm:$0xf] %vm67_vm1, %v263_v17  ;;  %v225_v22 = vsel %vm222_vm7, %v223_v52, %v224_v15  ;;  %v239_v23 = vsel %vm236_vm8, %v237_v61, %v238_v16  ;;  %v352_v25 = vmax.f32 %v350_v57, 0.0  ;;  %v353_v26 = vmax.f32 %v351_v18, 0.0  ;;  %v471_v15 = vld [vmem:[%s4227_s4 + $0x120] sm:$0xff]  ;;  %v472_v16 = vld [vmem:[%s4227_s4 + $0x128] sm:$0xff] }
  0xbf   :  { %228 = vrot.lane.b32.xlu1 %v225_v22, %s3327_s2  ;;  %v215_v4 = vrot.slane %v210_v55, 3  ;;  %v2898_v11 = vpack.c.bf16 %v464_v5, %v463_v6  ;;  %245 = vst.msk [vmem:[#allocation3 + $0x20] sm:$0x3f] %vm244_vm10, %v239_v23  ;;  %v358_v28 = vmax.f32 %v356_v20, 0.0  ;;  %v359_v29 = vmax.f32 %v357_v21, 0.0 }
  0xc0   :  { %v2900_v30 = vpack.c.bf16 %v448_v19, %v447_v56  ;;  %v2902_v32 = vpack.c.bf16 %v466_v10, %v465_v24  ;;  %v2904_v35 = vpack.c.bf16 %v450_v3, %v449_v27  ;;  %vm364_vm1 = vcmask 1045504   ;;  %v473_v56 = vld [vmem:[%s4227_s4 + $0x130] sm:$0xff]  ;;  %v474_v19 = vld [vmem:[%s4227_s4 + $0x138] sm:$0xff]  ;;  %v433_v10 = vld [vmem:[#allocation3 + $0x68] sm:$0x3] }
  0xc1   :  { %v216_v31 = vsel %vm213_vm9, %v214_v0, %v215_v4  ;;  %2899 = vmatprep.subr.bf16.mxu0 %v2898_v11  ;;  %v360_v33 = vmax.f32 %v352_v25, %v358_v28  ;;  %v361_v34 = vmax.f32 %v353_v26, %v359_v29  ;;  %v3328_v48 = vmov 0.0|0.0   ;;  %v422_v26 = vld [vmem:[#allocation3 + $0x10] sm:$0xff]  ;;  %v741_v29 = vld [vmem:[#allocation6 + $0xe0] sm:$0xff] }
  0xc2   :  { %221 = vst.msk [vmem:[#allocation3 + $0x18] sm:$0xff] %vm60_vm0, %v216_v31  ;;  %2901 = vmatpush3.bf16.msra.mxu0 %v2900_v30  ;;  %vm83_vm3 = vcmask 517120   ;;  %vm256_vm4 = vcmask 1048066   ;;  %vm258_vm6 = vcmask 1044992   ;;  %v2907_v0 = vpack.c.bf16 %v468_v59, %v467_v60  ;;  %v738_v28 = vld [vmem:[#allocation6 + $0xc8] sm:$0xff]  ;;  %v737_v31 = vld [vmem:[#allocation6 + $0xc0] sm:$0xff] }
  0xc3   :  { %2903 = vmatprep.subr.bf16.mxu0 %v2902_v32  ;;  %v411_v62 = vrot.slane %v360_v33, 6  ;;  %v412_v36 = vrot.slane %v361_v34, 6  ;;  %v389_v37 = vrot.slane %v360_v33, 4  ;;  %v390_v38 = vrot.slane %v361_v34, 4  ;;  %84 = vst.msk [vmem:[#allocation3 + $0x70] sm:$0x3] %vm83_vm3, %v3326_v2 }
  0xc4   :  { %v398_v39 = vrot.slane %v360_v33, 5  ;;  %v376_v40 = vrot.slane %v360_v33, 3  ;;  %v399_v41 = vrot.slane %v361_v34, 5  ;;  %v377_v42 = vrot.slane %v361_v34, 3  ;;  %v740_v32 = vld [vmem:[#allocation6 + $0xd8] sm:$0xff]  ;;  %v759_v59 = vld [vmem:[#allocation6 + $0x170] sm:$0xff] }
  0xc5   :  { %v413_v43 = vsel %vm246_vm5, %v411_v62, %v412_v36  ;;  %417 = vst.msk [vmem:[#allocation3 + $0x40] sm:$0xfc] %vm416_vm11, %v411_v62  ;;  %v391_v44 = vsel %vm222_vm7, %v389_v37, %v390_v38  ;;  %v365_v45 = vrot.slane %v360_v33, 2  ;;  %v366_v47 = vrot.slane %v361_v34, 2  ;;  %v425_v4 = vld [vmem:[#allocation3 + $0x28] sm:$0xff]  ;;  %v739_v33 = vld [vmem:[#allocation6 + $0xd0] sm:$0xff] }
  0xc6   :  { %2905 = vmatpush3.bf16.msra.mxu0 %v2904_v35  ;;  %395 = vst.msk [vmem:[#allocation3 + $0x38] sm:$0xf0] %vm394_vm13, %v389_v37  ;;  %401 = vrot.lane.b32.xlu0 %v398_v39, %s3327_s2  ;;  %v400_v52 = vsel %vm236_vm8, %v398_v39, %v399_v41  ;;  %v378_v54 = vsel %vm213_vm9, %v376_v40, %v377_v42  ;;  %vm232_vm5 = vcmask 1048068   ;;  %vm234_vm7 = vcmask 1047040   ;;  %v742_v35 = vld [vmem:[#allocation6 + $0xe8] sm:$0xff]  ;;  %v744_v36 = vld [vmem:[#allocation6 + $0xf8] sm:$0xff] }
  0xc7   :  { %419 = vst.msk [vmem:[#allocation3 + $0x58] sm:$0x1f] %vm418_vm12, %v413_v43  ;;  %379 = vrot.lane.b32.xlu1 %v376_v40, %s3327_s2  ;;  %2906 = vmatprep.subr.bf16.mxu0 %v3328_v48  ;;  %v367_v50 = vsel %vm364_vm1, %v365_v45, %v366_v47  ;;  %vm407_vm8 = vcmask 1048067   ;;  %vm385_vm9 = vcmask 1048069   ;;  %v2910_v14 = vpack.c.bf16 %v470_v9, %v469_v1  ;;  %v747_v37 = vld [vmem:[#allocation6 + $0x110] sm:$0xff]  ;;  %v746_v40 = vld [vmem:[#allocation6 + $0x108] sm:$0xff] }
  0xc8   :  { %397 = vst.msk [vmem:[#allocation3 + $0x50] sm:$0x7f] %vm396_vm15, %v391_v44  ;;  %vm409_vm10 = vcmask 1046016   ;;  %vm387_vm11 = vcmask 1048064   ;;  %v2913_v17 = vpack.c.bf16 %v472_v16, %v471_v15  ;;  %v2916_v20 = vpack.c.bf16 %v474_v19, %v473_v56  ;;  %v743_v39 = vld [vmem:[#allocation6 + $0xf0] sm:$0xff]  ;;  %v745_v41 = vld [vmem:[#allocation6 + $0x100] sm:$0xff] }
  0xc9   :  { %372 = vst.msk [vmem:[#allocation3 + $0x30] sm:$0xc0] %vm371_vm14, %v365_v45  ;;  %vm3329_vm12 = vmmov 0   ;;  %v2918_v30 = vpack.c.bf16 %v741_v29, %v738_v28  ;;  %v2920_v34 = vpack.c.bf16 %v740_v32, %v737_v31  ;;  %v2935_v62 = vpack.c.bf16 %v742_v35, %v739_v33  ;;  %v748_v43 = vld [vmem:[#allocation6 + $0x118] sm:$0xff]  ;;  %v750_v45 = vld [vmem:[#allocation6 + $0x128] sm:$0xff]  ;;  %v755_v1 = vld [vmem:[#allocation6 + $0x150] sm:$0xff] }
  0xca   :  { %375 = vst.msk [vmem:[#allocation3 + $0x60] sm:$0x1] %vm374_vm2, %v366_v47  ;;  %403 = vrot.lane.b32.xlu0 %v400_v52, %s3327_s2  ;;  %v434_v3 = vld [vmem:[#allocation3 + $0x70] sm:$0x3]  ;;  %v2922_v38 = vpack.c.bf16 %v747_v37, %v744_v36  ;;  %v2924_v42 = vpack.c.bf16 %v746_v40, %v743_v39  ;;  %v2938_v44 = vpack.c.bf16 %v748_v43, %v745_v41  ;;  %v753_v47 = vld [vmem:[#allocation6 + $0x140] sm:$0xff]  ;;  %v756_v60 = vld [vmem:[#allocation6 + $0x158] sm:$0xff] }
  0xcb   :  { %373 = vst.msk [vmem:[#allocation3 + $0x48] sm:$0xff] %vm60_vm0, %v367_v50  ;;  %381 = vrot.lane.b32.xlu1 %v378_v54, %s3327_s2  ;;  %2919 = vmatprep.subr.bf16.mxu1 %v2918_v30  ;;  %v2926_v50 = vpack.c.bf16 %v753_v47, %v750_v45  ;;  %v749_v52 = vld [vmem:[#allocation6 + $0x120] sm:$0xff]  ;;  %v752_v54 = vld [vmem:[#allocation6 + $0x138] sm:$0xff] }
  0xcc   :  { %v428_v11 = vld [vmem:[#allocation3 + $0x40] sm:$0xff]  ;;  %2921 = vmatpush1.bf16.msra.mxu1 %v2920_v34  ;;  %v2506_v28 = vld [vmem:[%s4229_s6] ss:$0 sm:$0xff] }
  0xcd   :  { %2923 = vmatprep.subr.bf16.mxu1 %v2922_v38  ;;  %v712_v15 = vld [vmem:[#allocation6 + $0x20] sm:$0xff] }
  0xce   :  { %v431_v27 = vld [vmem:[#allocation3 + $0x58] sm:$0xff] }
  0xd0   :  { %2925 = vmatpush1.bf16.msra.mxu1 %v2924_v42 }
  0xd1   :  { %v432_v25 = vld [vmem:[#allocation3 + $0x60] sm:$0x3]  ;;  %2927 = vmatprep.subr.bf16.mxu1 %v2926_v50 }
 0x12c   :  { %v251_v55 = vpop.permute.xlu0 %250  ;;  %v227_v58 = vpop.permute.xlu1 %226 }
 0x12d   :  { %257 = vst.msk [vmem:[#allocation3 + $0x8] sm:$0xfc] %vm256_vm4, %v251_v55  ;;  %v751_v55 = vld [vmem:[#allocation6 + $0x130] sm:$0xff] }
 0x12e   :  { %233 = vst.msk [vmem:[#allocation3] sm:$0xf0] %vm232_vm5, %v227_v58  ;;  %v2928_v58 = vpack.c.bf16 %v752_v54, %v749_v52 }
 0x130   :  { %v253_v63 = vpop.permute.xlu0 %252  ;;  %2929 = vmatpush1.bf16.msra.mxu1 %v2928_v58 }
 0x131   :  { %259 = vst.msk [vmem:[#allocation3 + $0x20] sm:$0x1f] %vm258_vm6, %v253_v63  ;;  %v229_v61 = vpop.permute.xlu1 %228  ;;  %v754_v63 = vld [vmem:[#allocation6 + $0x148] sm:$0xff] }
 0x132   :  { %235 = vst.msk [vmem:[#allocation3 + $0x18] sm:$0x7f] %vm234_vm7, %v229_v61  ;;  %v2941_v61 = vpack.c.bf16 %v754_v63, %v751_v55 }
 0x134   :  { %v421_v7 = vld [vmem:[#allocation3 + $0x8] sm:$0xff] }
 0x135   :  { %v420_v8 = vld [vmem:[#allocation3] sm:$0xff]  ;;  %554 = vmatprep.mubr.f32.mxu0 %v421_v7  ;;  %v758_v7 = vld [vmem:[#allocation6 + $0x168] sm:$0xff] }
 0x136   :  { %555 = vmatmul.mubr.f32.vlgmr.msra.gmra.mrb[0].mxu0 %v420_v8  ;;  %v757_v8 = vld [vmem:[#allocation6 + $0x160] sm:$0xff]  ;;  %v2932_v9 = vpack.c.bf16 %v758_v7, %v755_v1  ;;  %v713_v1 = vld [vmem:[#allocation6 + $0x28] sm:$0xff]  ;;  %v715_v7 = vld [vmem:[#allocation6 + $0x38] sm:$0xff] }
 0x137   :  { %2908 = vmatpush3.bf16.msra.mxu0 %v2907_v0  ;;  %v2930_v0 = vpack.c.bf16 %v759_v59, %v756_v60  ;;  %v708_v60 = vld [vmem:[#allocation6] sm:$0xff] }
 0x138   :  { %v424_v12 = vld [vmem:[#allocation3 + $0x20] sm:$0xff]  ;;  %2909 = vmatprep.subr.bf16.mxu0 %v3328_v48  ;;  %v402_v6 = vpop.permute.xlu0 %401 }
 0x139   :  { %v380_v5 = vpop.permute.xlu1 %379  ;;  %559 = vmatprep.mubr.f32.mxu0 %v424_v12  ;;  %v423_v13 = vld [vmem:[#allocation3 + $0x18] sm:$0xff]  ;;  %408 = vst.msk [vmem:[#allocation3 + $0x38] sm:$0xf8] %vm407_vm8, %v402_v6  ;;  %v709_v12 = vld [vmem:[#allocation6 + $0x8] sm:$0xff]  ;;  %2931 = vmatprep.subr.bf16.mxu1 %v2930_v0 }
 0x13a   :  { %386 = vst.msk [vmem:[#allocation3 + $0x30] sm:$0xe0] %vm385_vm9, %v380_v5  ;;  %560 = vmatmul.mubr.f32.gmra.mrb[2].mxu0 %v423_v13  ;;  %v2946_v6 = vpack.c.bf16 %v712_v15, %v709_v12  ;;  %2933 = vmatpush1.bf16.msra.mxu1 %v2932_v9  ;;  %v710_v0 = vld [vmem:[#allocation6 + $0x10] sm:$0xff] }
 0x13b   :  { %2911 = vmatpush3.bf16.msra.mxu0 %v2910_v14  ;;  %v760_v14 = vld [vmem:[#allocation6 + $0x178] sm:$0xff] }
 0x13c   :  { %2912 = vmatprep.subr.bf16.mxu0 %v3328_v48  ;;  %v404_v57 = vpop.permute.xlu0 %403  ;;  %v2944_v16 = vpack.c.bf16 %v760_v14, %v757_v8  ;;  %2947 = vmatprep.subr.bf16.mxu1 %v2946_v6  ;;  %v718_v8 = vld [vmem:[#allocation6 + $0x50] sm:$0xff]  ;;  %v2963_v6 = vpack.c.bf16 %v713_v1, %v710_v0  ;;  %v1066_v0 = vld [vmem:[#allocation6 + $0x1e0] sm:$0xff] }
 0x13d   :  { %v382_v18 = vpop.permute.xlu1 %381  ;;  %410 = vst.msk [vmem:[#allocation3 + $0x50] sm:$0x3f] %vm409_vm10, %v404_v57  ;;  %v714_v14 = vld [vmem:[#allocation6 + $0x30] sm:$0xff] }
 0x13e   :  { %388 = vst.msk [vmem:[#allocation3 + $0x48] sm:$0xff] %vm387_vm11, %v382_v18 }
 0x13f   :  { %2914 = vmatpush3.bf16.msra.mxu0 %v2913_v17 }
 0x140   :  { %2915 = vmatprep.subr.bf16.mxu0 %v3328_v48  ;;  %v427_v21 = vld [vmem:[#allocation3 + $0x38] sm:$0xff] }
 0x141   :  { %v426_v22 = vld [vmem:[#allocation3 + $0x30] sm:$0xff]  ;;  %564 = vmatprep.mubr.f32.mxu0 %v427_v21 }
 0x142   :  { %565 = vmatmul.mubr.f32.gmra.mrb[4].mxu0 %v426_v22 }
 0x143   :  { %2917 = vmatpush3.bf16.msra.mxu0 %v2916_v20 }
 0x144   :  { %v430_v23 = vld [vmem:[#allocation3 + $0x50] sm:$0xff]  ;;  %2934 = vmatprep.subr.bf16.mxu0 %v3328_v48 }
 0x145   :  { %v429_v24 = vld [vmem:[#allocation3 + $0x48] sm:$0xff]  ;;  %569 = vmatprep.mubr.f32.mxu0 %v430_v23 }
 0x146   :  { %570 = vmatmul.mubr.f32.gmra.mrb[6].mxu0 %v429_v24 }
 0x147   :  { %574 = vmatprep.mubr.f32.mxu0 %v433_v10 }
 0x14a   :  { %575 = vmatmul.mubr.f32.gmra.mrb[8].mxu0 %v432_v25 }
 0x14b   :  { %2707 = vmatprep.mubr.msk.f32.mxu0 %vm3329_vm12, %v3326_v2 }
 0x14e   :  { %2708 = vmatmul.mubr.msk.f32.vlgmr.msra.gmra.mrb[10].mxu0 %vm60_vm0, %v422_v26 }
 0x14f   :  { %2710 = vmatprep.mubr.msk.f32.mxu0 %vm3329_vm12, %v3326_v2  ;;  %2936 = vmatpush3.bf16.msra.mxu0 %v2935_v62 }
 0x150   :  { %2937 = vmatprep.subr.bf16.mxu0 %v3328_v48 }
 0x152   :  { %2711 = vmatmul.mubr.msk.f32.gmra.mrb[12].mxu0 %vm60_vm0, %v425_v4 }
 0x153   :  { %2713 = vmatprep.mubr.msk.f32.mxu0 %vm3329_vm12, %v3326_v2  ;;  %2939 = vmatpush3.bf16.msra.mxu0 %v2938_v44 }
 0x154   :  { %2940 = vmatprep.subr.bf16.mxu0 %v3328_v48 }
 0x156   :  { %2714 = vmatmul.mubr.msk.f32.gmra.mrb[14].mxu0 %vm60_vm0, %v428_v11  ;;  %v2505_v11 = vld [vmem:[%s4228_s5] ss:$0 sm:$0xff] }
 0x157   :  { %2716 = vmatprep.mubr.msk.f32.mxu0 %vm3329_vm12, %v3326_v2  ;;  %2942 = vmatpush3.bf16.msra.mxu0 %v2941_v61  ;;  %v711_v61 = vld [vmem:[#allocation6 + $0x18] sm:$0xff] }
 0x158   :  { %2943 = vmatprep.subr.bf16.mxu0 %v3328_v48 }
 0x15a   :  { %2717 = vmatmul.mubr.msk.f32.gmra.mrb[16].mxu0 %vm60_vm0, %v431_v27 }
 0x15b   :  { %2719 = vmatprep.mubr.msk.f32.mxu0 %vm3329_vm12, %v3326_v2  ;;  %2945 = vmatpush3.bf16.msra.mxu0 %v2944_v16  ;;  %v2948_v16 = vpack.c.bf16 %v711_v61, %v708_v60  ;;  %v1070_v60 = vld [vmem:[#allocation6 + $0x200] sm:$0xff] }
 0x15c   :  { %2962 = vmatprep.subr.bf16.mxu0 %v3328_v48 }
 0x15e   :  { %2720 = vmatmul.mubr.msk.f32.gmra.mrb[18].mxu0 %vm60_vm0, %v434_v3 }
 0x15f   :  { %2738 = vmatprep.mubr.msk.f32.mxu0 %vm3329_vm12, %v3326_v2 }
 0x209   :  { %v2556_v5 = vpop.f32.mrb[0].mxu0 }
 0x20a   :  { %v2557_v13 = vpop.f32.mrb[1].mxu0 }
 0x20b   :  { %v2558_v17 = vadd.f32 %v2557_v13, %v2556_v5  ;;  %v2950_v13 = vpack.c.bf16 %v718_v8, %v715_v7  ;;  %v1069_v7 = vld [vmem:[#allocation6 + $0x1f8] sm:$0xff]  ;;  %v1068_v8 = vld [vmem:[#allocation6 + $0x1f0] sm:$0xff] }
 0x20d   :  { %v2559_v57 = vpop.f32.mrb[2].mxu0 }
 0x20e   :  { %v2560_v18 = vpop.f32.mrb[3].mxu0 }
 0x20f   :  { %v2561_v56 = vadd.f32 %v2560_v18, %v2559_v57  ;;  %v716_v57 = vld [vmem:[#allocation6 + $0x40] sm:$0xff]  ;;  %v719_v18 = vld [vmem:[#allocation6 + $0x58] sm:$0xff] }
 0x215   :  { %v2562_v19 = vpop.f32.mrb[4].mxu0 }
 0x216   :  { %v2563_v20 = vpop.f32.mrb[5].mxu0 }
 0x217   :  { %v2564_v21 = vadd.f32 %v2563_v20, %v2562_v19  ;;  %v724_v19 = vld [vmem:[#allocation6 + $0x80] sm:$0xff] }
 0x219   :  { %v2565_v22 = vpop.f32.mrb[6].mxu0 }
 0x21a   :  { %v2566_v23 = vpop.f32.mrb[7].mxu0 }
 0x21b   :  { %v2567_v24 = vadd.f32 %v2566_v23, %v2565_v22  ;;  %v720_v22 = vld [vmem:[#allocation6 + $0x60] sm:$0xff] }
 0x21d   :  { %v2568_v10 = vpop.f32.mrb[8].mxu0 }
 0x21e   :  { %v2569_v25 = vpop.f32.mrb[9].mxu0 }
 0x21f   :  { %v2570_v26 = vadd.f32 %v2569_v25, %v2568_v10  ;;  %v722_v10 = vld [vmem:[#allocation6 + $0x70] sm:$0xff]  ;;  %v725_v25 = vld [vmem:[#allocation6 + $0x88] sm:$0xff] }
 0x221   :  { %v646_v4 = vpop.f32.mrb[10].mxu0 }
 0x222   :  { %v647_v27 = vadd.f32 %v2558_v17, %v646_v4  ;;  %v2709_v3 = vpop.f32.mrb[11].mxu0  ;;  %v717_v17 = vld [vmem:[#allocation6 + $0x48] sm:$0xff]  ;;  %v730_v4 = vld [vmem:[#allocation6 + $0xb0] sm:$0xff] }
 0x223   :  { %v2952_v20 = vpack.c.bf16 %v717_v17, %v714_v14  ;;  %v726_v3 = vld [vmem:[#allocation6 + $0x90] sm:$0xff]  ;;  %v1073_v14 = vld [vmem:[#allocation6 + $0x218] sm:$0xff]  ;;  %v1074_v17 = vld [vmem:[#allocation6 + $0x220] sm:$0xff] }
 0x224   :  { %v677_v29 = vmul.f32 %v2505_v11, %v647_v27  ;;  %v2969_v27 = vpack.c.bf16 %v725_v25, %v722_v10  ;;  %v1235_v10 = vld [vmem:[#allocation6 + $0x268] sm:$0xff]  ;;  %v1237_v25 = vld [vmem:[#allocation6 + $0x278] sm:$0xff] }
 0x225   :  { %v651_v30 = vpop.f32.mrb[12].mxu0 }
 0x226   :  { %v689_v31 = vadd.f32 %v2506_v28, %v677_v29  ;;  %v652_v32 = vadd.f32 %v2561_v56, %v651_v30  ;;  %v2712_v33 = vpop.f32.mrb[13].mxu0  ;;  %v721_v56 = vld [vmem:[#allocation6 + $0x68] sm:$0xff]  ;;  %v728_v30 = vld [vmem:[#allocation6 + $0xa0] sm:$0xff] }
 0x227   :  { %v2954_v23 = vpack.c.bf16 %v724_v19, %v721_v56  ;;  %v729_v29 = vld [vmem:[#allocation6 + $0xa8] sm:$0xff]  ;;  %v1058_v33 = vld [vmem:[#allocation6 + $0x1a0] sm:$0xff] }
 0x228   :  { %v694_v34 = vmax.f32 %v689_v31, 0.0  ;;  %v678_v35 = vmul.f32 %v2505_v11, %v652_v32  ;;  %v731_v31 = vld [vmem:[#allocation6 + $0xb8] sm:$0xff]  ;;  %v1055_v32 = vld [vmem:[#allocation6 + $0x188] sm:$0xff]  ;;  %v1234_v56 = vld [vmem:[#allocation6 + $0x260] sm:$0xff] }
 0x229   :  { %v656_v62 = vpop.f32.mrb[14].mxu0 }
 0x22a   :  { %699 = vst.msk [vmem:[#allocation4] sm:$0xff] %vm60_vm0, %v694_v34  ;;  %v690_v36 = vadd.f32 %v2506_v28, %v678_v35  ;;  %v657_v37 = vadd.f32 %v2564_v21, %v656_v62  ;;  %v2715_v38 = vpop.f32.mrb[15].mxu0  ;;  %v2966_v21 = vpack.c.bf16 %v719_v18, %v716_v57  ;;  %v2960_v34 = vpack.c.bf16 %v729_v29, %v726_v3  ;;  %v1054_v62 = vld [vmem:[#allocation6 + $0x180] sm:$0xff]  ;;  %v1077_v57 = vld [vmem:[#allocation6 + $0x238] sm:$0xff]  ;;  %v1231_v18 = vld [vmem:[#allocation6 + $0x248] sm:$0xff] }
 0x22b   :  { %v2972_v35 = vpack.c.bf16 %v731_v31, %v728_v30  ;;  %v2974_v38 = vpack.c.bf16 %v1058_v33, %v1055_v32  ;;  %v1239_v31 = vld [vmem:[#allocation6 + $0x288] sm:$0xff]  ;;  %v1238_v32 = vld [vmem:[#allocation6 + $0x280] sm:$0xff]  ;;  %v1241_v33 = vld [vmem:[#allocation6 + $0x298] sm:$0xff] }
 0x22c   :  { %v695_v39 = vmax.f32 %v690_v36, 0.0  ;;  %v679_v40 = vmul.f32 %v2505_v11, %v657_v37  ;;  %v1057_v36 = vld [vmem:[#allocation6 + $0x198] sm:$0xff]  ;;  %v1056_v37 = vld [vmem:[#allocation6 + $0x190] sm:$0xff] }
 0x22d   :  { %v661_v41 = vpop.f32.mrb[16].mxu0 }
 0x22e   :  { %700 = vst.msk [vmem:[#allocation4 + $0x8] sm:$0xff] %vm60_vm0, %v695_v39  ;;  %v691_v42 = vadd.f32 %v2506_v28, %v679_v40  ;;  %v662_v43 = vadd.f32 %v2567_v24, %v661_v41  ;;  %v2718_v44 = vpop.f32.mrb[17].mxu0  ;;  %v723_v24 = vld [vmem:[#allocation6 + $0x78] sm:$0xff]  ;;  %v1059_v39 = vld [vmem:[#allocation6 + $0x1a8] sm:$0xff]  ;;  %v1064_v41 = vld [vmem:[#allocation6 + $0x1d0] sm:$0xff] }
 0x22f   :  { %v1061_v40 = vld [vmem:[#allocation6 + $0x1b8] sm:$0xff]  ;;  %v2976_v44 = vpack.c.bf16 %v1057_v36, %v1054_v62  ;;  %v3022_v36 = vpack.c.bf16 %v1241_v33, %v1238_v32  ;;  %v1583_v33 = vld [vmem:[#allocation6 + $0x3c8] sm:$0xff] }
 0x230   :  { %v696_v45 = vmax.f32 %v691_v42, 0.0  ;;  %v680_v47 = vmul.f32 %v2505_v11, %v662_v43  ;;  %v1429_v32 = vld [vmem:[#allocation6 + $0x3b8] sm:$0xff] }
 0x231   :  { %v666_v50 = vpop.f32.mrb[18].mxu0 }
 0x232   :  { %701 = vst.msk [vmem:[#allocation4 + $0x10] sm:$0xff] %vm60_vm0, %v696_v45  ;;  %v692_v52 = vadd.f32 %v2506_v28, %v680_v47  ;;  %v667_v54 = vadd.f32 %v2570_v26, %v666_v50  ;;  %v2721_v55 = vpop.f32.mrb[19].mxu0  ;;  %v727_v26 = vld [vmem:[#allocation6 + $0x98] sm:$0xff]  ;;  %v2991_v45 = vpack.c.bf16 %v1059_v39, %v1056_v37  ;;  %v1060_v47 = vld [vmem:[#allocation6 + $0x1b0] sm:$0xff]  ;;  %v1242_v37 = vld [vmem:[#allocation6 + $0x2a0] sm:$0xff] }
 0x233   :  { %v1062_v55 = vld [vmem:[#allocation6 + $0x1c0] sm:$0xff]  ;;  %v1245_v39 = vld [vmem:[#allocation6 + $0x2b8] sm:$0xff] }
 0x234   :  { %v697_v58 = vmax.f32 %v692_v52, 0.0  ;;  %v681_v63 = vmul.f32 %v2505_v11, %v667_v54  ;;  %v2956_v11 = vpack.c.bf16 %v723_v24, %v720_v22  ;;  %v2978_v52 = vpack.c.bf16 %v1064_v41, %v1061_v40  ;;  %v1063_v54 = vld [vmem:[#allocation6 + $0x1c8] sm:$0xff]  ;;  %v1233_v22 = vld [vmem:[#allocation6 + $0x258] sm:$0xff]  ;;  %v1244_v40 = vld [vmem:[#allocation6 + $0x2b0] sm:$0xff] }
 0x235   :  { %v3002_v24 = vpack.c.bf16 %v1234_v56, %v1231_v18  ;;  %v1247_v41 = vld [vmem:[#allocation6 + $0x2c8] sm:$0xff]  ;;  %v1414_v18 = vld [vmem:[#allocation6 + $0x340] sm:$0xff]  ;;  %v1417_v56 = vld [vmem:[#allocation6 + $0x358] sm:$0xff] }
 0x236   :  { %702 = vst.msk [vmem:[#allocation4 + $0x18] sm:$0xff] %vm60_vm0, %v697_v58  ;;  %v693_v59 = vadd.f32 %v2506_v28, %v681_v63  ;;  %v2958_v28 = vpack.c.bf16 %v730_v4, %v727_v26  ;;  %v1065_v58 = vld [vmem:[#allocation6 + $0x1d8] sm:$0xff]  ;;  %v1067_v63 = vld [vmem:[#allocation6 + $0x1e8] sm:$0xff]  ;;  %v1240_v26 = vld [vmem:[#allocation6 + $0x290] sm:$0xff] }
 0x237   :  { %v2994_v61 = vpack.c.bf16 %v1065_v58, %v1062_v55  ;;  %v2982_v1 = vpack.c.bf16 %v1070_v60, %v1067_v63  ;;  %v3006_v30 = vpack.c.bf16 %v1240_v26, %v1237_v25  ;;  %v1253_v55 = vld [vmem:[#allocation6 + $0x2f8] sm:$0xff]  ;;  %v1407_v58 = vld [vmem:[#allocation6 + $0x308] sm:$0xff]  ;;  %v1410_v63 = vld [vmem:[#allocation6 + $0x320] sm:$0xff] }
 0x238   :  { %v698_v9 = vmax.f32 %v693_v59, 0.0  ;;  %v2980_v59 = vpack.c.bf16 %v1063_v54, %v1060_v47  ;;  %v1248_v47 = vld [vmem:[#allocation6 + $0x2d0] sm:$0xff]  ;;  %v1250_v54 = vld [vmem:[#allocation6 + $0x2e0] sm:$0xff]  ;;  %v1423_v26 = vld [vmem:[#allocation6 + $0x388] sm:$0xff] }
 0x239   :  { %v733_v12 = vld [vmem:[#allocation4 + $0x2] ss:$17 sm:$0x3]  ;;  %v735_v15 = vld [vmem:[#allocation4 + $0x3] ss:$17 sm:$0x3] }
 0x23a   :  { %703 = vst.msk [vmem:[#allocation4 + $0x20] sm:$0x3] %vm83_vm3, %v698_v9  ;;  %v736_v5 = vmax.f32 %v733_v12, %v735_v15  ;;  %v704_v42 = vld [vmem:[#allocation4] ss:$17 sm:$0x3]  ;;  %v2984_v15 = vpack.c.bf16 %v1069_v7, %v1066_v0  ;;  %v3030_v0 = vpack.c.bf16 %v1410_v63, %v1407_v58  ;;  %v1590_v58 = vld [vmem:[#allocation6 + $0x400] sm:$0xff] }
 0x23b   :  { %v706_v43 = vld [vmem:[#allocation4 + $0x1] ss:$17 sm:$0x3]  ;;  %v1076_v12 = vld [vmem:[#allocation6 + $0x230] sm:$0xff] }
 0x23c   :  { %2507 = vmatmul.mubr.msk.f32.vlgmr.msra.gmra.mrb[0].mxu1 %vm60_vm0, %v736_v5  ;;  %2739 = vmatmul.mubr.msk.f32.vlgmr.msra.gmra.mrb[20].mxu0 %vm60_vm0, %v736_v5  ;;  %v707_v50 = vmax.f32 %v704_v42, %v706_v43  ;;  %v1071_v9 = vld [vmem:[#allocation6 + $0x208] sm:$0xff]  ;;  %v2986_v5 = vpack.c.bf16 %v1076_v12, %v1073_v14  ;;  %v1249_v42 = vld [vmem:[#allocation6 + $0x2d8] sm:$0xff]  ;;  %v1252_v43 = vld [vmem:[#allocation6 + $0x2f0] sm:$0xff] }
 0x23d   :  { %2949 = vmatpush1.bf16.msra.mxu1 %v2948_v16  ;;  %2964 = vmatpush3.bf16.msra.mxu0 %v2963_v6  ;;  %v2997_v16 = vpack.c.bf16 %v1071_v9, %v1068_v8  ;;  %v1072_v6 = vld [vmem:[#allocation6 + $0x210] sm:$0xff]  ;;  %v1050_v4 = vld [vmem:[#allocation4 + $0x4] ss:$17 sm:$0x3] }
 0x23e   :  { %2951 = vmatprep.subr.bf16.mxu1 %v2950_v13  ;;  %2965 = vmatprep.subr.bf16.mxu0 %v3328_v48  ;;  %v1075_v13 = vld [vmem:[#allocation6 + $0x228] sm:$0xff]  ;;  %v1408_v7 = vld [vmem:[#allocation6 + $0x310] sm:$0xff]  ;;  %v1413_v14 = vld [vmem:[#allocation6 + $0x338] sm:$0xff] }
 0x23f   :  { %972 = vmatprep.mubr.f32.mxu1 %v3326_v2  ;;  %2757 = vmatprep.mubr.msk.f32.mxu0 %vm3329_vm12, %v3326_v2  ;;  %v2988_v19 = vpack.c.bf16 %v1075_v13, %v1072_v6  ;;  %v1411_v8 = vld [vmem:[#allocation6 + $0x328] sm:$0xff]  ;;  %v1416_v12 = vld [vmem:[#allocation6 + $0x350] sm:$0xff]  ;;  %v1593_v63 = vld [vmem:[#allocation6 + $0x418] sm:$0xff] }
 0x240   :  { %v1228_v9 = vld [vmem:[#allocation4 + $0x7] ss:$17 sm:$0x3]  ;;  %v3047_v6 = vpack.c.bf16 %v1411_v8, %v1408_v7  ;;  %v1420_v25 = vld [vmem:[#allocation6 + $0x370] sm:$0xff] }
 0x241   :  { %2953 = vmatpush1.bf16.msra.mxu1 %v2952_v20  ;;  %2967 = vmatpush3.bf16.msra.mxu0 %v2966_v21  ;;  %v3000_v20 = vpack.c.bf16 %v1077_v57, %v1074_v17  ;;  %v1230_v21 = vld [vmem:[#allocation6 + $0x240] sm:$0xff]  ;;  %v3034_v17 = vpack.c.bf16 %v1416_v12, %v1413_v14  ;;  %v1415_v57 = vld [vmem:[#allocation6 + $0x348] sm:$0xff]  ;;  %v1597_v8 = vld [vmem:[#allocation6 + $0x438] sm:$0xff] }
 0x242   :  { %2955 = vmatprep.subr.bf16.mxu1 %v2954_v23  ;;  %2968 = vmatprep.subr.bf16.mxu0 %v3328_v48  ;;  %v1232_v23 = vld [vmem:[#allocation6 + $0x250] sm:$0xff]  ;;  %v1599_v14 = vld [vmem:[#allocation6 + $0x448] sm:$0xff]  ;;  %v1601_v12 = vld [vmem:[#allocation6 + $0x458] sm:$0xff] }
 0x243   :  { %v3019_v3 = vpack.c.bf16 %v1235_v10, %v1232_v23  ;;  %v1418_v23 = vld [vmem:[#allocation6 + $0x360] sm:$0xff]  ;;  %v1421_v10 = vld [vmem:[#allocation6 + $0x378] sm:$0xff] }
 0x245   :  { %2957 = vmatpush1.bf16.msra.mxu1 %v2956_v11  ;;  %2970 = vmatpush3.bf16.msra.mxu0 %v2969_v27  ;;  %v1052_v11 = vld [vmem:[#allocation4 + $0x5] ss:$17 sm:$0x3]  ;;  %v3004_v27 = vpack.c.bf16 %v1233_v22, %v1230_v21  ;;  %v3050_v22 = vpack.c.bf16 %v1417_v56, %v1414_v18 }
 0x246   :  { %2959 = vmatprep.subr.bf16.mxu1 %v2958_v28  ;;  %2971 = vmatprep.subr.bf16.mxu0 %v3328_v48  ;;  %v1236_v28 = vld [vmem:[#allocation6 + $0x270] sm:$0xff]  ;;  %v1053_v29 = vmax.f32 %v1050_v4, %v1052_v11  ;;  %v1425_v4 = vld [vmem:[#allocation6 + $0x398] sm:$0xff]  ;;  %v1759_v56 = vld [vmem:[#allocation6 + $0x488] sm:$0xff] }
 0x247   :  { %v3008_v62 = vpack.c.bf16 %v1239_v31, %v1236_v28  ;;  %v1428_v11 = vld [vmem:[#allocation6 + $0x3b0] sm:$0xff]  ;;  %v1426_v31 = vld [vmem:[#allocation6 + $0x3a0] sm:$0xff]  ;;  %v1605_v18 = vld [vmem:[#allocation6 + $0x478] sm:$0xff] }
 0x248   :  { %v1424_v28 = vld [vmem:[#allocation6 + $0x390] sm:$0xff] }
 0x249   :  { %2961 = vmatpush1.bf16.msra.mxu1 %v2960_v34  ;;  %2973 = vmatpush3.bf16.msra.mxu0 %v2972_v35  ;;  %v1243_v34 = vld [vmem:[#allocation6 + $0x2a8] sm:$0xff]  ;;  %v1246_v35 = vld [vmem:[#allocation6 + $0x2c0] sm:$0xff] }
 0x24a   :  { %2975 = vmatprep.subr.bf16.mxu1 %v2974_v38  ;;  %2990 = vmatprep.subr.bf16.mxu0 %v3328_v48  ;;  %v3010_v38 = vpack.c.bf16 %v1246_v35, %v1243_v34  ;;  %v1586_v34 = vld [vmem:[#allocation6 + $0x3e0] sm:$0xff] }
 0x24c   :  { %2509 = vmatmul.mubr.msk.f32.vlgmr.msra.gmra.mrb[0].mxu1 %vm60_vm0, %v707_v50  ;;  %2758 = vmatmul.mubr.msk.f32.vlgmr.msra.gmra.mrb[22].mxu0 %vm60_vm0, %v707_v50  ;;  %v3014_v50 = vpack.c.bf16 %v1252_v43, %v1249_v42  ;;  %v1592_v42 = vld [vmem:[#allocation6 + $0x410] sm:$0xff] }
 0x24d   :  { %2977 = vmatpush1.bf16.msra.mxu1 %v2976_v44  ;;  %2992 = vmatpush3.bf16.msra.mxu0 %v2991_v45  ;;  %v3012_v44 = vpack.c.bf16 %v1245_v39, %v1242_v37  ;;  %v3025_v45 = vpack.c.bf16 %v1247_v41, %v1244_v40  ;;  %v1585_v37 = vld [vmem:[#allocation6 + $0x3d8] sm:$0xff]  ;;  %v3058_v39 = vpack.c.bf16 %v1586_v34, %v1583_v33  ;;  %v1587_v40 = vld [vmem:[#allocation6 + $0x3e8] sm:$0xff]  ;;  %v1766_v33 = vld [vmem:[#allocation6 + $0x4c0] sm:$0xff] }
 0x24e   :  { %2979 = vmatprep.subr.bf16.mxu1 %v2978_v52  ;;  %2993 = vmatprep.subr.bf16.mxu0 %v3328_v48  ;;  %v1251_v52 = vld [vmem:[#allocation6 + $0x2e8] sm:$0xff]  ;;  %v1589_v41 = vld [vmem:[#allocation6 + $0x3f8] sm:$0xff] }
 0x24f   :  { %1145 = vmatprep.mubr.f32.mxu1 %v3326_v2  ;;  %2776 = vmatprep.mubr.msk.f32.mxu0 %vm3329_vm12, %v3326_v2  ;;  %v3016_v60 = vpack.c.bf16 %v1251_v52, %v1248_v47  ;;  %v1402_v43 = vld [vmem:[#allocation4 + $0x8] ss:$17 sm:$0x3] }
 0x250   :  { %v1769_v34 = vld [vmem:[#allocation6 + $0x4d8] sm:$0xff] }
 0x251   :  { %2981 = vmatpush1.bf16.msra.mxu1 %v2980_v59  ;;  %2995 = vmatpush3.bf16.msra.mxu0 %v2994_v61  ;;  %v3028_v59 = vpack.c.bf16 %v1253_v55, %v1250_v54  ;;  %v1406_v61 = vld [vmem:[#allocation6 + $0x300] sm:$0xff]  ;;  %v3062_v54 = vpack.c.bf16 %v1592_v42, %v1589_v41  ;;  %v1591_v55 = vld [vmem:[#allocation6 + $0x408] sm:$0xff]  ;;  %v1772_v41 = vld [vmem:[#allocation6 + $0x4f0] sm:$0xff] }
 0x252   :  { %2983 = vmatprep.subr.bf16.mxu1 %v2982_v1  ;;  %2996 = vmatprep.subr.bf16.mxu0 %v3328_v48  ;;  %v1409_v1 = vld [vmem:[#allocation6 + $0x318] sm:$0xff]  ;;  %v1775_v42 = vld [vmem:[#allocation6 + $0x508] sm:$0xff] }
 0x255   :  { %2985 = vmatpush1.bf16.msra.mxu1 %v2984_v15  ;;  %2998 = vmatpush3.bf16.msra.mxu0 %v2997_v16  ;;  %v1226_v15 = vld [vmem:[#allocation4 + $0x6] ss:$17 sm:$0x3]  ;;  %v3032_v16 = vpack.c.bf16 %v1409_v1, %v1406_v61  ;;  %v1594_v1 = vld [vmem:[#allocation6 + $0x420] sm:$0xff] }
 0x256   :  { %2987 = vmatprep.subr.bf16.mxu1 %v2986_v5  ;;  %2999 = vmatprep.subr.bf16.mxu0 %v3328_v48  ;;  %v1412_v5 = vld [vmem:[#allocation6 + $0x330] sm:$0xff]  ;;  %v1229_v13 = vmax.f32 %v1226_v15, %v1228_v9 }
 0x257   :  { %v3036_v21 = vpack.c.bf16 %v1415_v57, %v1412_v5  ;;  %v1596_v9 = vld [vmem:[#allocation6 + $0x430] sm:$0xff]  ;;  %v1602_v57 = vld [vmem:[#allocation6 + $0x460] sm:$0xff] }
 0x258   :  { %v1604_v15 = vld [vmem:[#allocation6 + $0x470] sm:$0xff] }
 0x259   :  { %2989 = vmatpush1.bf16.msra.mxu1 %v2988_v19  ;;  %3001 = vmatpush3.bf16.msra.mxu0 %v3000_v20  ;;  %v1419_v19 = vld [vmem:[#allocation6 + $0x368] sm:$0xff]  ;;  %v1422_v20 = vld [vmem:[#allocation6 + $0x380] sm:$0xff]  ;;  %v1600_v5 = vld [vmem:[#allocation6 + $0x450] sm:$0xff] }
 0x25a   :  { %3003 = vmatprep.subr.bf16.mxu1 %v3002_v24  ;;  %3018 = vmatprep.subr.bf16.mxu0 %v3328_v48  ;;  %v3038_v24 = vpack.c.bf16 %v1422_v20, %v1419_v19  ;;  %v1762_v19 = vld [vmem:[#allocation6 + $0x4a0] sm:$0xff] }
 0x25c   :  { %2511 = vmatmul.mubr.msk.f32.vlgmr.msra.gmra.mrb[0].mxu1 %vm60_vm0, %v1053_v29  ;;  %2777 = vmatmul.mubr.msk.f32.vlgmr.msra.gmra.mrb[24].mxu0 %vm60_vm0, %v1053_v29  ;;  %v3042_v29 = vpack.c.bf16 %v1428_v11, %v1425_v4  ;;  %v1768_v4 = vld [vmem:[#allocation6 + $0x4d0] sm:$0xff] }
 0x25d   :  { %3005 = vmatpush1.bf16.msra.mxu1 %v3004_v27  ;;  %3020 = vmatpush3.bf16.msra.mxu0 %v3019_v3  ;;  %v3040_v27 = vpack.c.bf16 %v1421_v10, %v1418_v23  ;;  %v3053_v3 = vpack.c.bf16 %v1423_v26, %v1420_v25  ;;  %v1761_v23 = vld [vmem:[#allocation6 + $0x498] sm:$0xff]  ;;  %v3086_v10 = vpack.c.bf16 %v1762_v19, %v1759_v56  ;;  %v1763_v25 = vld [vmem:[#allocation6 + $0x4a8] sm:$0xff]  ;;  %v1578_v11 = vld [vmem:[#allocation4 + $0xa] ss:$17 sm:$0x3] }
 0x25e   :  { %3007 = vmatprep.subr.bf16.mxu1 %v3006_v30  ;;  %3021 = vmatprep.subr.bf16.mxu0 %v3328_v48  ;;  %v1427_v30 = vld [vmem:[#allocation6 + $0x3a8] sm:$0xff]  ;;  %v1765_v26 = vld [vmem:[#allocation6 + $0x4b8] sm:$0xff]  ;;  %v1942_v56 = vld [vmem:[#allocation6 + $0x580] sm:$0xff] }
 0x25f   :  { %1321 = vmatprep.mubr.f32.mxu1 %v3326_v2  ;;  %2795 = vmatprep.mubr.msk.f32.mxu0 %vm3329_vm12, %v3326_v2  ;;  %v3044_v35 = vpack.c.bf16 %v1427_v30, %v1424_v28  ;;  %v1945_v19 = vld [vmem:[#allocation6 + $0x598] sm:$0xff] }
 0x261   :  { %3009 = vmatpush1.bf16.msra.mxu1 %v3008_v62  ;;  %3023 = vmatpush3.bf16.msra.mxu0 %v3022_v36  ;;  %v3056_v62 = vpack.c.bf16 %v1429_v32, %v1426_v31  ;;  %v1582_v36 = vld [vmem:[#allocation6 + $0x3c0] sm:$0xff]  ;;  %v3090_v31 = vpack.c.bf16 %v1768_v4, %v1765_v26  ;;  %v1767_v32 = vld [vmem:[#allocation6 + $0x4c8] sm:$0xff]  ;;  %v1948_v26 = vld [vmem:[#allocation6 + $0x5b0] sm:$0xff] }
 0x262   :  { %3011 = vmatprep.subr.bf16.mxu1 %v3010_v38  ;;  %3024 = vmatprep.subr.bf16.mxu0 %v3328_v48  ;;  %v1584_v38 = vld [vmem:[#allocation6 + $0x3d0] sm:$0xff]  ;;  %v1951_v4 = vld [vmem:[#allocation6 + $0x5c8] sm:$0xff] }
 0x263   :  { %v3075_v47 = vpack.c.bf16 %v1587_v40, %v1584_v38  ;;  %v1770_v38 = vld [vmem:[#allocation6 + $0x4e0] sm:$0xff]  ;;  %v1773_v40 = vld [vmem:[#allocation6 + $0x4f8] sm:$0xff] }
 0x265   :  { %3013 = vmatpush1.bf16.msra.mxu1 %v3012_v44  ;;  %3026 = vmatpush3.bf16.msra.mxu0 %v3025_v45  ;;  %v1404_v44 = vld [vmem:[#allocation4 + $0x9] ss:$17 sm:$0x3]  ;;  %v3060_v45 = vpack.c.bf16 %v1585_v37, %v1582_v36  ;;  %v3106_v37 = vpack.c.bf16 %v1769_v34, %v1766_v33  ;;  %v1957_v33 = vld [vmem:[#allocation6 + $0x5f8] sm:$0xff] }
 0x266   :  { %3015 = vmatprep.subr.bf16.mxu1 %v3014_v50  ;;  %3027 = vmatprep.subr.bf16.mxu0 %v3328_v48  ;;  %v1588_v50 = vld [vmem:[#allocation6 + $0x3f0] sm:$0xff]  ;;  %v1405_v52 = vmax.f32 %v1402_v43, %v1404_v44  ;;  %v1777_v43 = vld [vmem:[#allocation6 + $0x518] sm:$0xff] }
 0x267   :  { %v3064_v61 = vpack.c.bf16 %v1591_v55, %v1588_v50  ;;  %v1780_v44 = vld [vmem:[#allocation6 + $0x530] sm:$0xff]  ;;  %v1778_v55 = vld [vmem:[#allocation6 + $0x520] sm:$0xff] }
 0x268   :  { %v1776_v50 = vld [vmem:[#allocation6 + $0x510] sm:$0xff] }
 0x269   :  { %3017 = vmatpush1.bf16.msra.mxu1 %v3016_v60  ;;  %3029 = vmatpush3.bf16.msra.mxu0 %v3028_v59  ;;  %v1595_v60 = vld [vmem:[#allocation6 + $0x428] sm:$0xff]  ;;  %v1598_v59 = vld [vmem:[#allocation6 + $0x440] sm:$0xff] }
 0x26a   :  { %3031 = vmatprep.subr.bf16.mxu1 %v3030_v0  ;;  %3046 = vmatprep.subr.bf16.mxu0 %v3328_v48  ;;  %v3078_v0 = vpack.c.bf16 %v1593_v63, %v1590_v58  ;;  %v3066_v7 = vpack.c.bf16 %v1598_v59, %v1595_v60  ;;  %v1781_v58 = vld [vmem:[#allocation6 + $0x538] sm:$0xff]  ;;  %v1935_v63 = vld [vmem:[#allocation6 + $0x548] sm:$0xff]  ;;  %v1938_v60 = vld [vmem:[#allocation6 + $0x560] sm:$0xff] }
 0x26c   :  { %2513 = vmatmul.mubr.msk.f32.vlgmr.msra.gmra.mrb[0].mxu1 %vm60_vm0, %v1229_v13  ;;  %2796 = vmatmul.mubr.msk.f32.vlgmr.msra.gmra.mrb[26].mxu0 %vm60_vm0, %v1229_v13  ;;  %v3070_v13 = vpack.c.bf16 %v1604_v15, %v1601_v12  ;;  %v1944_v12 = vld [vmem:[#allocation6 + $0x590] sm:$0xff] }
 0x26d   :  { %3033 = vmatpush1.bf16.msra.mxu1 %v3032_v16  ;;  %3048 = vmatpush3.bf16.msra.mxu0 %v3047_v6  ;;  %v3068_v16 = vpack.c.bf16 %v1597_v8, %v1594_v1  ;;  %v3081_v6 = vpack.c.bf16 %v1599_v14, %v1596_v9  ;;  %v1937_v1 = vld [vmem:[#allocation6 + $0x558] sm:$0xff]  ;;  %v3114_v8 = vpack.c.bf16 %v1938_v60, %v1935_v63  ;;  %v1939_v9 = vld [vmem:[#allocation6 + $0x568] sm:$0xff]  ;;  %v1754_v15 = vld [vmem:[#allocation4 + $0xc] ss:$17 sm:$0x3] }
 0x26e   :  { %3035 = vmatprep.subr.bf16.mxu1 %v3034_v17  ;;  %3049 = vmatprep.subr.bf16.mxu0 %v3328_v48  ;;  %v1603_v17 = vld [vmem:[#allocation6 + $0x468] sm:$0xff]  ;;  %v1941_v14 = vld [vmem:[#allocation6 + $0x578] sm:$0xff] }
 0x26f   :  { %1497 = vmatprep.mubr.f32.mxu1 %v3326_v2  ;;  %2814 = vmatprep.mubr.msk.f32.mxu0 %vm3329_vm12, %v3326_v2  ;;  %v3072_v20 = vpack.c.bf16 %v1603_v17, %v1600_v5  ;;  %v2136_v63 = vld [vmem:[%s4232_s9 + $0x40] sm:$0xff]  ;;  %v2138_v60 = vld [vmem:[%s4232_s9 + $0x50] sm:$0xff] }
 0x271   :  { %3037 = vmatpush1.bf16.msra.mxu1 %v3036_v21  ;;  %3051 = vmatpush3.bf16.msra.mxu0 %v3050_v22  ;;  %v3084_v21 = vpack.c.bf16 %v1605_v18, %v1602_v57  ;;  %v1758_v22 = vld [vmem:[#allocation6 + $0x480] sm:$0xff]  ;;  %v3118_v57 = vpack.c.bf16 %v1944_v12, %v1941_v14  ;;  %v1943_v18 = vld [vmem:[#allocation6 + $0x588] sm:$0xff] }
 0x272   :  { %3039 = vmatprep.subr.bf16.mxu1 %v3038_v24  ;;  %3052 = vmatprep.subr.bf16.mxu0 %v3328_v48  ;;  %v1760_v24 = vld [vmem:[#allocation6 + $0x490] sm:$0xff]  ;;  %v2147_v14 = vld [vmem:[%s4232_s9 + $0x98] sm:$0xff] }
 0x273   :  { %v3103_v28 = vpack.c.bf16 %v1763_v25, %v1760_v24  ;;  %v1946_v24 = vld [vmem:[#allocation6 + $0x5a0] sm:$0xff]  ;;  %v1949_v25 = vld [vmem:[#allocation6 + $0x5b8] sm:$0xff] }
 0x275   :  { %3041 = vmatpush1.bf16.msra.mxu1 %v3040_v27  ;;  %3054 = vmatpush3.bf16.msra.mxu0 %v3053_v3  ;;  %v1580_v27 = vld [vmem:[#allocation4 + $0xb] ss:$17 sm:$0x3]  ;;  %v3088_v3 = vpack.c.bf16 %v1761_v23, %v1758_v22  ;;  %v3134_v23 = vpack.c.bf16 %v1945_v19, %v1942_v56  ;;  %v2150_v56 = vld [vmem:[%s4232_s9 + $0xb0] sm:$0xff] }
 0x276   :  { %3043 = vmatprep.subr.bf16.mxu1 %v3042_v29  ;;  %3055 = vmatprep.subr.bf16.mxu0 %v3328_v48  ;;  %v1764_v29 = vld [vmem:[#allocation6 + $0x4b0] sm:$0xff]  ;;  %v1581_v30 = vmax.f32 %v1578_v11, %v1580_v27  ;;  %v1953_v11 = vld [vmem:[#allocation6 + $0x5d8] sm:$0xff] }
 0x277   :  { %v3092_v36 = vpack.c.bf16 %v1767_v32, %v1764_v29  ;;  %v1956_v27 = vld [vmem:[#allocation6 + $0x5f0] sm:$0xff]  ;;  %v1954_v32 = vld [vmem:[#allocation6 + $0x5e0] sm:$0xff] }
 0x278   :  { %v1952_v29 = vld [vmem:[#allocation6 + $0x5d0] sm:$0xff] }
 0x279   :  { %3045 = vmatpush1.bf16.msra.mxu1 %v3044_v35  ;;  %3057 = vmatpush3.bf16.msra.mxu0 %v3056_v62  ;;  %v1771_v35 = vld [vmem:[#allocation6 + $0x4e8] sm:$0xff]  ;;  %v1774_v62 = vld [vmem:[#allocation6 + $0x500] sm:$0xff] }
 0x27a   :  { %3059 = vmatprep.subr.bf16.mxu1 %v3058_v39  ;;  %3074 = vmatprep.subr.bf16.mxu0 %v3328_v48  ;;  %v3094_v39 = vpack.c.bf16 %v1774_v62, %v1771_v35  ;;  %v3140_v35 = vpack.c.bf16 %v1957_v33, %v1954_v32  ;;  %v1932_v62 = vld [vmem:[#allocation4 + $0xf] ss:$17 sm:$0x3]  ;;  %v2153_v19 = vld [vmem:[%s4232_s9 + $0xc8] sm:$0xff] }
 0x27b   :  { %v2162_v32 = vld [vmem:[%s4232_s9 + $0x110] sm:$0xff]  ;;  %v2165_v33 = vld [vmem:[%s4232_s9 + $0x128] sm:$0xff] }
 0x27c   :  { %2515 = vmatmul.mubr.msk.f32.vlgmr.msra.gmra.mrb[0].mxu1 %vm60_vm0, %v1405_v52  ;;  %2815 = vmatmul.mubr.msk.f32.vlgmr.msra.gmra.mrb[28].mxu0 %vm60_vm0, %v1405_v52  ;;  %v3098_v52 = vpack.c.bf16 %v1780_v44, %v1777_v43  ;;  %v2135_v43 = vld [vmem:[%s4232_s9 + $0x38] sm:$0xff] }
 0x27d   :  { %3061 = vmatpush1.bf16.msra.mxu1 %v3060_v45  ;;  %3076 = vmatpush3.bf16.msra.mxu0 %v3075_v47  ;;  %v3096_v45 = vpack.c.bf16 %v1773_v40, %v1770_v38  ;;  %v3109_v47 = vpack.c.bf16 %v1775_v42, %v1772_v41  ;;  %v2129_v38 = vld [vmem:[%s4232_s9 + $0x8] sm:$0xff]  ;;  %v2130_v41 = vld [vmem:[%s4232_s9 + $0x10] sm:$0xff] }
 0x27e   :  { %3063 = vmatprep.subr.bf16.mxu1 %v3062_v54  ;;  %3077 = vmatprep.subr.bf16.mxu0 %v3328_v48  ;;  %v1779_v54 = vld [vmem:[#allocation6 + $0x528] sm:$0xff] }
 0x27f   :  { %1673 = vmatprep.mubr.f32.mxu1 %v3326_v2  ;;  %2833 = vmatprep.mubr.msk.f32.mxu0 %vm3329_vm12, %v3326_v2  ;;  %v3100_v59 = vpack.c.bf16 %v1779_v54, %v1776_v50  ;;  %v2133_v42 = vld [vmem:[%s4232_s9 + $0x28] sm:$0xff]  ;;  %v2134_v50 = vld [vmem:[%s4232_s9 + $0x30] sm:$0xff]  ;;  %v2139_v54 = vld [vmem:[%s4232_s9 + $0x58] sm:$0xff] }
 0x281   :  { %3065 = vmatpush1.bf16.msra.mxu1 %v3064_v61  ;;  %3079 = vmatpush3.bf16.msra.mxu0 %v3078_v0  ;;  %v3112_v61 = vpack.c.bf16 %v1781_v58, %v1778_v55  ;;  %v1934_v0 = vld [vmem:[#allocation6 + $0x540] sm:$0xff] }
 0x282   :  { %3067 = vmatprep.subr.bf16.mxu1 %v3066_v7  ;;  %3080 = vmatprep.subr.bf16.mxu0 %v3328_v48  ;;  %v1936_v7 = vld [vmem:[#allocation6 + $0x550] sm:$0xff] }
 0x283   :  { %v3131_v5 = vpack.c.bf16 %v1939_v9, %v1936_v7  ;;  %v2145_v9 = vld [vmem:[%s4232_s9 + $0x88] sm:$0xff] }
 0x285   :  { %3069 = vmatpush1.bf16.msra.mxu1 %v3068_v16  ;;  %3082 = vmatpush3.bf16.msra.mxu0 %v3081_v6  ;;  %v1756_v16 = vld [vmem:[#allocation4 + $0xd] ss:$17 sm:$0x3]  ;;  %v3116_v6 = vpack.c.bf16 %v1937_v1, %v1934_v0  ;;  %v2140_v1 = vld [vmem:[%s4232_s9 + $0x60] sm:$0xff] }
 0x286   :  { %3071 = vmatprep.subr.bf16.mxu1 %v3070_v13  ;;  %3083 = vmatprep.subr.bf16.mxu0 %v3328_v48  ;;  %v1940_v13 = vld [vmem:[#allocation6 + $0x570] sm:$0xff]  ;;  %v1757_v17 = vmax.f32 %v1754_v15, %v1756_v16  ;;  %v2143_v0 = vld [vmem:[%s4232_s9 + $0x78] sm:$0xff]  ;;  %v3158_v15 = vpack.c.bf16 %v2147_v14, %v2145_v9  ;;  %v2144_v16 = vld [vmem:[%s4232_s9 + $0x80] sm:$0xff] }
 0x287   :  { %v3120_v22 = vpack.c.bf16 %v1943_v18, %v1940_v13  ;;  %v2151_v13 = vld [vmem:[%s4232_s9 + $0xb8] sm:$0xff]  ;;  %v2148_v18 = vld [vmem:[%s4232_s9 + $0xa0] sm:$0xff]  ;;  %v2182_v9 = vld [vmem:[%s4232_s9 + $0x1b0] sm:$0xff] }
 0x288   :  { %v2185_v14 = vld [vmem:[%s4232_s9 + $0x1c8] sm:$0xff] }
 0x289   :  { %3073 = vmatpush1.bf16.msra.mxu1 %v3072_v20  ;;  %3085 = vmatpush3.bf16.msra.mxu0 %v3084_v21  ;;  %v1947_v20 = vld [vmem:[#allocation6 + $0x5a8] sm:$0xff]  ;;  %v1950_v21 = vld [vmem:[#allocation6 + $0x5c0] sm:$0xff] }
 0x28a   :  { %3087 = vmatprep.subr.bf16.mxu1 %v3086_v10  ;;  %3102 = vmatprep.subr.bf16.mxu0 %v3328_v48  ;;  %v3122_v10 = vpack.c.bf16 %v1950_v21, %v1947_v20  ;;  %v2155_v20 = vld [vmem:[%s4232_s9 + $0xd8] sm:$0xff]  ;;  %v3164_v21 = vpack.c.bf16 %v2150_v56, %v2148_v18  ;;  %v2188_v18 = vld [vmem:[%s4232_s9 + $0x1e0] sm:$0xff] }
 0x28c   :  { %2517 = vmatmul.mubr.msk.f32.vlgmr.msra.gmra.mrb[0].mxu1 %vm60_vm0, %v1581_v30  ;;  %2834 = vmatmul.mubr.msk.f32.vlgmr.msra.gmra.mrb[30].mxu0 %vm60_vm0, %v1581_v30  ;;  %v3126_v30 = vpack.c.bf16 %v1956_v27, %v1953_v11  ;;  %v2158_v27 = vld [vmem:[%s4232_s9 + $0xf0] sm:$0xff] }
 0x28d   :  { %3089 = vmatpush1.bf16.msra.mxu1 %v3088_v3  ;;  %3104 = vmatpush3.bf16.msra.mxu0 %v3103_v28  ;;  %v3124_v3 = vpack.c.bf16 %v1949_v25, %v1946_v24  ;;  %v3137_v28 = vpack.c.bf16 %v1951_v4, %v1948_v26  ;;  %v2154_v24 = vld [vmem:[%s4232_s9 + $0xd0] sm:$0xff]  ;;  %v2157_v25 = vld [vmem:[%s4232_s9 + $0xe8] sm:$0xff]  ;;  %v2159_v26 = vld [vmem:[%s4232_s9 + $0xf8] sm:$0xff] }
 0x28e   :  { %3091 = vmatprep.subr.bf16.mxu1 %v3090_v31  ;;  %3105 = vmatprep.subr.bf16.mxu0 %v3328_v48  ;;  %v1955_v31 = vld [vmem:[#allocation6 + $0x5e8] sm:$0xff]  ;;  %v3170_v11 = vpack.c.bf16 %v2159_v26, %v2157_v25 }
 0x28f   :  { %1849 = vmatprep.mubr.f32.mxu1 %v3326_v2  ;;  %2852 = vmatprep.mubr.msk.f32.mxu0 %vm3329_vm12, %v3326_v2  ;;  %v3128_v34 = vpack.c.bf16 %v1955_v31, %v1952_v29  ;;  %v2156_v4 = vld [vmem:[%s4232_s9 + $0xe0] sm:$0xff] }
 0x290   :  { %v3172_v29 = vpack.c.bf16 %v2158_v27, %v2156_v4  ;;  %v2160_v31 = vld [vmem:[%s4232_s9 + $0x100] sm:$0xff]  ;;  %v2397_v27 = vld [vmem:[%s4234_s11 + $0x88] sm:$0xff] }
 0x291   :  { %3093 = vmatpush1.bf16.msra.mxu1 %v3092_v36  ;;  %3107 = vmatpush3.bf16.msra.mxu0 %v3106_v37  ;;  %v1930_v36 = vld [vmem:[#allocation4 + $0xe] ss:$17 sm:$0x3] }
 0x292   :  { %3095 = vmatprep.subr.bf16.mxu1 %v3094_v39  ;;  %3108 = vmatprep.subr.bf16.mxu0 %v3328_v48  ;;  %v1933_v37 = vmax.f32 %v1930_v36, %v1932_v62  ;;  %v2131_v39 = vld [vmem:[%s4232_s9 + $0x18] sm:$0xff]  ;;  %v2164_v36 = vld [vmem:[%s4232_s9 + $0x120] sm:$0xff] }
 0x293   :  { %v3142_v40 = vpack.c.bf16 %v2131_v39, %v2129_v38  ;;  %v2169_v38 = vld [vmem:[%s4232_s9 + $0x148] sm:$0xff]  ;;  %v2171_v39 = vld [vmem:[%s4232_s9 + $0x158] sm:$0xff] }
 0x295   :  { %3097 = vmatpush1.bf16.msra.mxu1 %v3096_v45  ;;  %3110 = vmatpush3.bf16.msra.mxu0 %v3109_v47  ;;  %v3146_v45 = vpack.c.bf16 %v2135_v43, %v2133_v42  ;;  %v2132_v47 = vld [vmem:[%s4232_s9 + $0x20] sm:$0xff]  ;;  %v2170_v42 = vld [vmem:[%s4232_s9 + $0x150] sm:$0xff] }
 0x296   :  { %3099 = vmatprep.subr.bf16.mxu1 %v3098_v52  ;;  %3111 = vmatprep.subr.bf16.mxu0 %v3328_v48  ;;  %v2137_v52 = vld [vmem:[%s4232_s9 + $0x48] sm:$0xff]  ;;  %v3148_v55 = vpack.c.bf16 %v2134_v50, %v2132_v47  ;;  %v2172_v47 = vld [vmem:[%s4232_s9 + $0x160] sm:$0xff] }
 0x297   :  { %v3150_v58 = vpack.c.bf16 %v2139_v54, %v2137_v52  ;;  %v2174_v52 = vld [vmem:[%s4232_s9 + $0x170] sm:$0xff]  ;;  %v2177_v54 = vld [vmem:[%s4232_s9 + $0x188] sm:$0xff] }
 0x299   :  { %3101 = vmatpush1.bf16.msra.mxu1 %v3100_v59  ;;  %3113 = vmatpush3.bf16.msra.mxu0 %v3112_v61  ;;  %v3152_v59 = vpack.c.bf16 %v2138_v60, %v2136_v63  ;;  %v2141_v61 = vld [vmem:[%s4232_s9 + $0x68] sm:$0xff]  ;;  %v2176_v60 = vld [vmem:[%s4232_s9 + $0x180] sm:$0xff] }
 0x29a   :  { %3115 = vmatprep.subr.bf16.mxu1 %v3114_v8  ;;  %3130 = vmatprep.subr.bf16.mxu0 %v3328_v48  ;;  %v3154_v7 = vpack.c.bf16 %v2143_v0, %v2141_v61  ;;  %v2142_v8 = vld [vmem:[%s4232_s9 + $0x70] sm:$0xff]  ;;  %v2181_v61 = vld [vmem:[%s4232_s9 + $0x1a8] sm:$0xff]  ;;  %v2183_v0 = vld [vmem:[%s4232_s9 + $0x1b8] sm:$0xff] }
 0x29b   :  { %v3156_v12 = vpack.c.bf16 %v2142_v8, %v2140_v1  ;;  %v2180_v8 = vld [vmem:[%s4232_s9 + $0x1a0] sm:$0xff] }
 0x29c   :  { %2519 = vmatmul.mubr.msk.f32.vlgmr.msra.gmra.mrb[0].mxu1 %vm60_vm0, %v1757_v17  ;;  %2853 = vmatmul.mubr.msk.f32.vlgmr.msra.gmra.mrb[32].mxu0 %vm60_vm0, %v1757_v17 }
 0x29d   :  { %3117 = vmatpush1.bf16.msra.mxu1 %v3116_v6  ;;  %3132 = vmatpush3.bf16.msra.mxu0 %v3131_v5  ;;  %v2146_v6 = vld [vmem:[%s4232_s9 + $0x90] sm:$0xff]  ;;  %v2149_v5 = vld [vmem:[%s4232_s9 + $0xa8] sm:$0xff] }
 0x29e   :  { %3119 = vmatprep.subr.bf16.mxu1 %v3118_v57  ;;  %3133 = vmatprep.subr.bf16.mxu0 %v3328_v48  ;;  %v3160_v17 = vpack.c.bf16 %v2146_v6, %v2144_v16  ;;  %v3162_v57 = vpack.c.bf16 %v2151_v13, %v2149_v5  ;;  %v2184_v6 = vld [vmem:[%s4232_s9 + $0x1c0] sm:$0xff]  ;;  %v2186_v5 = vld [vmem:[%s4232_s9 + $0x1d0] sm:$0xff] }
 0x29f   :  { %2025 = vmatprep.mubr.f32.mxu1 %v3326_v2  ;;  %2871 = vmatprep.mubr.msk.f32.mxu0 %vm3329_vm12, %v3326_v2  ;;  %v3200_v13 = vpack.c.bf16 %v2186_v5, %v2184_v6 }
 0x2a1   :  { %3121 = vmatpush1.bf16.msra.mxu1 %v3120_v22  ;;  %3135 = vmatpush3.bf16.msra.mxu0 %v3134_v23  ;;  %v3166_v22 = vpack.c.bf16 %v2155_v20, %v2153_v19  ;;  %v2152_v23 = vld [vmem:[%s4232_s9 + $0xc0] sm:$0xff]  ;;  %v2190_v19 = vld [vmem:[%s4232_s9 + $0x1f0] sm:$0xff]  ;;  %v2193_v20 = vld [vmem:[%s4232_s9 + $0x208] sm:$0xff] }
 0x2a2   :  { %3123 = vmatprep.subr.bf16.mxu1 %v3122_v10  ;;  %3136 = vmatprep.subr.bf16.mxu0 %v3328_v48  ;;  %v3168_v10 = vpack.c.bf16 %v2154_v24, %v2152_v23 }
 0x2a5   :  { %3125 = vmatpush1.bf16.msra.mxu1 %v3124_v3  ;;  %3138 = vmatpush3.bf16.msra.mxu0 %v3137_v28  ;;  %v2161_v3 = vld [vmem:[%s4232_s9 + $0x108] sm:$0xff]  ;;  %v2163_v28 = vld [vmem:[%s4232_s9 + $0x118] sm:$0xff] }
 0x2a6   :  { %3127 = vmatprep.subr.bf16.mxu1 %v3126_v30  ;;  %3139 = vmatprep.subr.bf16.mxu0 %v3328_v48  ;;  %v2128_v48 = vld [vmem:[%s4232_s9] sm:$0xff]  ;;  %v3174_v30 = vpack.c.bf16 %v2163_v28, %v2161_v3 }
 0x2a7   :  { %v3144_v44 = vpack.c.bf16 %v2130_v41, %v2128_v48  ;;  %v2168_v41 = vld [vmem:[%s4232_s9 + $0x140] sm:$0xff] }
 0x2a8   :  { %v3184_v43 = vpack.c.bf16 %v2170_v42, %v2168_v41  ;;  %v2380_v3 = vld [vmem:[%s4234_s11] sm:$0xff]  ;;  %v2403_v41 = vld [vmem:[%s4234_s11 + $0xb8] sm:$0xff] }
 0x2a9   :  { %3129 = vmatpush1.bf16.msra.mxu1 %v3128_v34  ;;  %3141 = vmatpush3.bf16.msra.mxu0 %v3140_v35  ;;  %v2167_v34 = vld [vmem:[%s4232_s9 + $0x138] sm:$0xff]  ;;  %v3176_v35 = vpack.c.bf16 %v2162_v32, %v2160_v31 }
 0x2aa   :  { %3143 = vmatprep.subr.bf16.mxu1 %v3142_v40  ;;  %v3178_v62 = vpack.c.bf16 %v2167_v34, %v2165_v33  ;;  %v3182_v40 = vpack.c.bf16 %v2171_v39, %v2169_v38  ;;  %v2399_v31 = vld [vmem:[%s4234_s11 + $0x98] sm:$0xff]  ;;  %v2382_v34 = vld [vmem:[%s4234_s11 + $0x10] sm:$0xff]  ;;  %v2384_v39 = vld [vmem:[%s4234_s11 + $0x20] sm:$0xff] }
 0x2ac   :  { %2521 = vmatmul.mubr.msk.f32.vlgmr.msra.gmra.mrb[0].mxu1 %vm60_vm0, %v1933_v37  ;;  %2872 = vmatmul.mubr.msk.f32.vlgmr.msra.gmra.mrb[34].mxu0 %vm60_vm0, %v1933_v37  ;;  %v2166_v37 = vld [vmem:[%s4232_s9 + $0x130] sm:$0xff]  ;;  %vm2489_vm0 = vcmask 1024  }
 0x2ad   :  { %3145 = vmatpush1.bf16.msra.mxu1 %v3144_v44  ;;  %v3180_v48 = vpack.c.bf16 %v2166_v37, %v2164_v36  ;;  %v2173_v44 = vld [vmem:[%s4232_s9 + $0x168] sm:$0xff] }
 0x2ae   :  { %3147 = vmatprep.subr.bf16.mxu1 %v3146_v45  ;;  %v2175_v45 = vld [vmem:[%s4232_s9 + $0x178] sm:$0xff]  ;;  %v2401_v36 = vld [vmem:[%s4234_s11 + $0xa8] sm:$0xff] }
 0x2af   :  { %v3186_v50 = vpack.c.bf16 %v2175_v45, %v2173_v44  ;;  %v2386_v45 = vld [vmem:[%s4234_s11 + $0x30] sm:$0xff] }
 0x2b1   :  { %3149 = vmatpush1.bf16.msra.mxu1 %v3148_v55  ;;  %v2179_v55 = vld [vmem:[%s4232_s9 + $0x198] sm:$0xff] }
 0x2b2   :  { %3151 = vmatprep.subr.bf16.mxu1 %v3150_v58  ;;  %v3188_v58 = vpack.c.bf16 %v2174_v52, %v2172_v47  ;;  %v3190_v63 = vpack.c.bf16 %v2179_v55, %v2177_v54  ;;  %v2387_v47 = vld [vmem:[%s4234_s11 + $0x38] sm:$0xff]  ;;  %v2404_v54 = vld [vmem:[%s4234_s11 + $0xc0] sm:$0xff]  ;;  %v2405_v55 = vld [vmem:[%s4234_s11 + $0xc8] sm:$0xff] }
 0x2b5   :  { %3153 = vmatpush1.bf16.msra.mxu1 %v3152_v59  ;;  %v2178_v59 = vld [vmem:[%s4232_s9 + $0x190] sm:$0xff] }
 0x2b6   :  { %3155 = vmatprep.subr.bf16.mxu1 %v3154_v7  ;;  %v3192_v1 = vpack.c.bf16 %v2178_v59, %v2176_v60  ;;  %v3194_v7 = vpack.c.bf16 %v2183_v0, %v2181_v61  ;;  %v2388_v60 = vld [vmem:[%s4234_s11 + $0x40] sm:$0xff]  ;;  %v2389_v59 = vld [vmem:[%s4234_s11 + $0x48] sm:$0xff]  ;;  %v2406_v61 = vld [vmem:[%s4234_s11 + $0xd0] sm:$0xff] }
 0x2b7   :  { %v2407_v0 = vld [vmem:[%s4234_s11 + $0xd8] sm:$0xff] }
 0x2b9   :  { %3157 = vmatpush1.bf16.msra.mxu1 %v3156_v12  ;;  %v2187_v12 = vld [vmem:[%s4232_s9 + $0x1d8] sm:$0xff] }
 0x2ba   :  { %3159 = vmatprep.subr.bf16.mxu1 %v3158_v15  ;;  %v3196_v15 = vpack.c.bf16 %v2182_v9, %v2180_v8  ;;  %v3198_v16 = vpack.c.bf16 %v2187_v12, %v2185_v14  ;;  %v2390_v8 = vld [vmem:[%s4234_s11 + $0x50] sm:$0xff]  ;;  %v2391_v9 = vld [vmem:[%s4234_s11 + $0x58] sm:$0xff]  ;;  %v2408_v14 = vld [vmem:[%s4234_s11 + $0xe0] sm:$0xff] }
 0x2bb   :  { %v2409_v12 = vld [vmem:[%s4234_s11 + $0xe8] sm:$0xff] }
 0x2bd   :  { %3161 = vmatpush1.bf16.msra.mxu1 %v3160_v17  ;;  %v2189_v17 = vld [vmem:[%s4232_s9 + $0x1e8] sm:$0xff] }
 0x2be   :  { %3163 = vmatprep.subr.bf16.mxu1 %v3162_v57  ;;  %v2191_v57 = vld [vmem:[%s4232_s9 + $0x1f8] sm:$0xff] }
 0x2bf   :  { %v3202_v56 = vpack.c.bf16 %v2191_v57, %v2189_v17 }
 0x2c1   :  { %3165 = vmatpush1.bf16.msra.mxu1 %v3164_v21  ;;  %v2195_v21 = vld [vmem:[%s4232_s9 + $0x218] sm:$0xff] }
 0x2c2   :  { %3167 = vmatprep.subr.bf16.mxu1 %v3166_v22  ;;  %v3204_v22 = vpack.c.bf16 %v2190_v19, %v2188_v18  ;;  %v3206_v23 = vpack.c.bf16 %v2195_v21, %v2193_v20 }
 0x2c5   :  { %3169 = vmatpush1.bf16.msra.mxu1 %v3168_v10 }
 0x2c6   :  { %3171 = vmatprep.subr.bf16.mxu1 %v3170_v11  ;;  %v2396_v11 = vld [vmem:[%s4234_s11 + $0x80] sm:$0xff] }
 0x2c7   :  { %v3238_v28 = vpack.c.bf16 %v2397_v27, %v2396_v11 }
 0x2c9   :  { %3173 = vmatpush1.bf16.msra.mxu1 %v3172_v29  ;;  %v2381_v29 = vld [vmem:[%s4234_s11 + $0x8] sm:$0xff]  ;;  %3239 = vmatprep.subr.bf16.mxu0 %v3238_v28 }
 0x2ca   :  { %3175 = vmatprep.subr.bf16.mxu1 %v3174_v30  ;;  %v2398_v30 = vld [vmem:[%s4234_s11 + $0x90] sm:$0xff]  ;;  %v3240_v32 = vpack.c.bf16 %v2381_v29, %v2380_v3  ;;  %v2192_v29 = vld [vmem:[%s4232_s9 + $0x200] sm:$0xff] }
 0x2cb   :  { %v3242_v33 = vpack.c.bf16 %v2399_v31, %v2398_v30  ;;  %v2194_v30 = vld [vmem:[%s4232_s9 + $0x210] sm:$0xff] }
 0x2cc   :  { %3241 = vmatpush3.bf16.msra.mxu0 %v3240_v32  ;;  %v2197_v32 = vld [vmem:[%s4232_s9 + $0x228] sm:$0xff] }
 0x2cd   :  { %3177 = vmatpush1.bf16.msra.mxu1 %v3176_v35  ;;  %v2383_v35 = vld [vmem:[%s4234_s11 + $0x18] sm:$0xff]  ;;  %3243 = vmatprep.subr.bf16.mxu0 %v3242_v33 }
 0x2ce   :  { %3179 = vmatprep.subr.bf16.mxu1 %v3178_v62  ;;  %v2400_v62 = vld [vmem:[%s4234_s11 + $0xa0] sm:$0xff]  ;;  %v3244_v37 = vpack.c.bf16 %v2383_v35, %v2382_v34  ;;  %v2199_v33 = vld [vmem:[%s4232_s9 + $0x238] sm:$0xff]  ;;  %v3208_v35 = vpack.c.bf16 %v2194_v30, %v2192_v29 }
 0x2cf   :  { %v3246_v38 = vpack.c.bf16 %v2401_v36, %v2400_v62  ;;  %v3210_v36 = vpack.c.bf16 %v2199_v33, %v2197_v32 }
 0x2d0   :  { %3245 = vmatpush3.bf16.msra.mxu0 %v3244_v37  ;;  %v2196_v37 = vld [vmem:[%s4232_s9 + $0x220] sm:$0xff] }
 0x2d1   :  { %3181 = vmatpush1.bf16.msra.mxu1 %v3180_v48  ;;  %v2385_v48 = vld [vmem:[%s4234_s11 + $0x28] sm:$0xff]  ;;  %3247 = vmatprep.subr.bf16.mxu0 %v3246_v38  ;;  %v2198_v38 = vld [vmem:[%s4232_s9 + $0x230] sm:$0xff] }
 0x2d2   :  { %3183 = vmatprep.subr.bf16.mxu1 %v3182_v40  ;;  %v2402_v40 = vld [vmem:[%s4234_s11 + $0xb0] sm:$0xff]  ;;  %v3248_v42 = vpack.c.bf16 %v2385_v48, %v2384_v39  ;;  %v2201_v39 = vld [vmem:[%s4232_s9 + $0x248] sm:$0xff]  ;;  %v2203_v48 = vld [vmem:[%s4232_s9 + $0x258] sm:$0xff] }
 0x2d3   :  { %v3250_v44 = vpack.c.bf16 %v2403_v41, %v2402_v40  ;;  %v3212_v40 = vpack.c.bf16 %v2198_v38, %v2196_v37  ;;  %v3214_v41 = vpack.c.bf16 %v2203_v48, %v2201_v39 }
 0x2d4   :  { %3249 = vmatpush3.bf16.msra.mxu0 %v3248_v42  ;;  %v2200_v42 = vld [vmem:[%s4232_s9 + $0x240] sm:$0xff] }
 0x2d5   :  { %3185 = vmatpush1.bf16.msra.mxu1 %v3184_v43  ;;  %3251 = vmatprep.subr.bf16.mxu0 %v3250_v44  ;;  %v2205_v44 = vld [vmem:[%s4232_s9 + $0x268] sm:$0xff] }
 0x2d6   :  { %3187 = vmatprep.subr.bf16.mxu1 %v3186_v50 }
 0x2d9   :  { %3189 = vmatpush1.bf16.msra.mxu1 %v3188_v58  ;;  %v3252_v58 = vpack.c.bf16 %v2387_v47, %v2386_v45  ;;  %v2207_v45 = vld [vmem:[%s4232_s9 + $0x278] sm:$0xff] }
 0x2da   :  { %3191 = vmatprep.subr.bf16.mxu1 %v3190_v63  ;;  %v3254_v63 = vpack.c.bf16 %v2405_v55, %v2404_v54  ;;  %v3218_v47 = vpack.c.bf16 %v2207_v45, %v2205_v44  ;;  %v2209_v54 = vld [vmem:[%s4232_s9 + $0x288] sm:$0xff]  ;;  %v2211_v55 = vld [vmem:[%s4232_s9 + $0x298] sm:$0xff] }
 0x2db   :  { %3253 = vmatpush3.bf16.msra.mxu0 %v3252_v58 }
 0x2dc   :  { %3255 = vmatprep.subr.bf16.mxu0 %v3254_v63  ;;  %v3222_v63 = vpack.c.bf16 %v2211_v55, %v2209_v54 }
 0x2dd   :  { %3193 = vmatpush1.bf16.msra.mxu1 %v3192_v1  ;;  %v3256_v1 = vpack.c.bf16 %v2389_v59, %v2388_v60  ;;  %v2208_v60 = vld [vmem:[%s4232_s9 + $0x280] sm:$0xff]  ;;  %v2210_v59 = vld [vmem:[%s4232_s9 + $0x290] sm:$0xff] }
 0x2de   :  { %3195 = vmatprep.subr.bf16.mxu1 %v3194_v7  ;;  %v3258_v7 = vpack.c.bf16 %v2407_v0, %v2406_v61  ;;  %v2213_v61 = vld [vmem:[%s4232_s9 + $0x2a8] sm:$0xff]  ;;  %v2215_v0 = vld [vmem:[%s4232_s9 + $0x2b8] sm:$0xff] }
 0x2df   :  { %3257 = vmatpush3.bf16.msra.mxu0 %v3256_v1  ;;  %v3224_v1 = vpack.c.bf16 %v2210_v59, %v2208_v60 }
 0x2e0   :  { %3259 = vmatprep.subr.bf16.mxu0 %v3258_v7  ;;  %v3226_v7 = vpack.c.bf16 %v2215_v0, %v2213_v61 }
 0x2e1   :  { %3197 = vmatpush1.bf16.msra.mxu1 %v3196_v15  ;;  %v3260_v15 = vpack.c.bf16 %v2391_v9, %v2390_v8  ;;  %v2212_v8 = vld [vmem:[%s4232_s9 + $0x2a0] sm:$0xff]  ;;  %v2214_v9 = vld [vmem:[%s4232_s9 + $0x2b0] sm:$0xff] }
 0x2e2   :  { %3199 = vmatprep.subr.bf16.mxu1 %v3198_v16  ;;  %v3262_v16 = vpack.c.bf16 %v2409_v12, %v2408_v14  ;;  %v2217_v14 = vld [vmem:[%s4232_s9 + $0x2c8] sm:$0xff]  ;;  %v2219_v12 = vld [vmem:[%s4232_s9 + $0x2d8] sm:$0xff] }
 0x2e3   :  { %3261 = vmatpush3.bf16.msra.mxu0 %v3260_v15  ;;  %v3228_v15 = vpack.c.bf16 %v2214_v9, %v2212_v8 }
 0x2e4   :  { %3263 = vmatprep.subr.bf16.mxu0 %v3262_v16  ;;  %v3230_v16 = vpack.c.bf16 %v2219_v12, %v2217_v14 }
 0x2e5   :  { %3201 = vmatpush1.bf16.msra.mxu1 %v3200_v13 }
 0x2e6   :  { %3203 = vmatprep.subr.bf16.mxu1 %v3202_v56 }
 0x2e9   :  { %3205 = vmatpush1.bf16.msra.mxu1 %v3204_v22 }
 0x2ea   :  { %3207 = vmatprep.subr.bf16.mxu1 %v3206_v23 }
 0x30f   :  { %v901_v24 = vpop.f32.mrb[20].mxu0 }
 0x310   :  { %v2740_v10 = vpop.f32.mrb[21].mxu0 }
 0x31f   :  { %v1045_v25 = vpop.f32.mrb[22].mxu0 }
 0x320   :  { %v1046_v26 = vadd.f32 %v1045_v25, %v901_v24  ;;  %v2759_v4 = vpop.f32.mrb[23].mxu0  ;;  %v4094_v24 = vld [vmem:[%s4231_s8] sm:$0x7] }
 0x321   :  { %v2110_v10 = vrot.slane %v4094_v24, %v3539_v49  ;;  %v2114_v25 = vrot.slane %v4094_v24, %v3545_v51 }
 0x32f   :  { %v1218_v43 = vpop.f32.mrb[24].mxu0 }
 0x330   :  { %v1224_v50 = vadd.f32 %v1218_v43, %v1046_v26  ;;  %v2778_v52 = vpop.f32.mrb[25].mxu0  ;;  %v2202_v43 = vld [vmem:[%s4232_s9 + $0x250] sm:$0xff] }
 0x331   :  { %v2206_v52 = vld [vmem:[%s4232_s9 + $0x270] sm:$0xff] }
 0x33f   :  { %v1394_v6 = vpop.f32.mrb[26].mxu0 }
 0x340   :  { %v1400_v5 = vadd.f32 %v1394_v6, %v1224_v50  ;;  %v2797_v13 = vpop.f32.mrb[27].mxu0  ;;  %v2204_v50 = vld [vmem:[%s4232_s9 + $0x260] sm:$0xff] }
 0x341   :  { %v3220_v58 = vpack.c.bf16 %v2206_v52, %v2204_v50  ;;  %v2216_v6 = vld [vmem:[%s4232_s9 + $0x2c0] sm:$0xff]  ;;  %v2221_v13 = vld [vmem:[%s4232_s9 + $0x2e8] sm:$0xff] }
 0x34f   :  { %v1570_v17 = vpop.f32.mrb[28].mxu0 }
 0x350   :  { %v1576_v57 = vadd.f32 %v1570_v17, %v1400_v5  ;;  %v2816_v18 = vpop.f32.mrb[29].mxu0  ;;  %v2218_v5 = vld [vmem:[%s4232_s9 + $0x2d0] sm:$0xff]  ;;  %v2223_v17 = vld [vmem:[%s4232_s9 + $0x2f8] sm:$0xff] }
 0x351   :  { %v2118_v18 = vrot.slane %v4094_v24, %v139_v53  ;;  %v2393_v53 = vld [vmem:[%s4234_s11 + $0x68] sm:$0xff] }
 0x352   :  { %v3264_v24 = vpack.c.bf16 %v2393_v53, %v2392_v46 }
 0x354   :  { %3265 = vmatpush3.bf16.msra.mxu0 %v3264_v24 }
 0x35f   :  { %v1746_v56 = vpop.f32.mrb[30].mxu0 }
 0x360   :  { %v1752_v19 = vadd.f32 %v1746_v56, %v1576_v57  ;;  %v2835_v20 = vpop.f32.mrb[31].mxu0  ;;  %v3232_v57 = vpack.c.bf16 %v2218_v5, %v2216_v6  ;;  %v3234_v56 = vpack.c.bf16 %v2223_v17, %v2221_v13 }
 0x361   :  { %v2222_v20 = vld [vmem:[%s4232_s9 + $0x2f0] sm:$0xff] }
 0x36f   :  { %v1922_v21 = vpop.f32.mrb[32].mxu0 }
 0x370   :  { %v1928_v22 = vadd.f32 %v1922_v21, %v1752_v19  ;;  %v2854_v23 = vpop.f32.mrb[33].mxu0  ;;  %v2220_v19 = vld [vmem:[%s4232_s9 + $0x2e0] sm:$0xff] }
 0x371   :  { %v3236_v21 = vpack.c.bf16 %v2222_v20, %v2220_v19 }
 0x37f   :  { %v2027_v26 = vpop.f32.mrb[0].mxu1  ;;  %v2098_v4 = vpop.f32.mrb[34].mxu0 }
 0x380   :  { %v2122_v11 = vadd.f32 %v2110_v10, %v2027_v26  ;;  %v4100_v27 = vadd.f32 %v2098_v4, %v1928_v22  ;;  %v2029_v3 = vpop.f32.mrb[1].mxu1  ;;  %v2873_v28 = vpop.f32.mrb[35].mxu0  ;;  %v2410_v10 = vld [vmem:[%s4234_s11 + $0xf0] sm:$0xff] }
 0x381   :  { %v2123_v31 = vadd.f32 %v2114_v25, %v2029_v3  ;;  %v2411_v25 = vld [vmem:[%s4234_s11 + $0xf8] sm:$0xff]  ;;  %v2394_v26 = vld [vmem:[%s4234_s11 + $0x70] sm:$0xff]  ;;  %v2224_v3 = vld [vmem:[%s4233_s10] sm:$0x3] }
 0x382   :  { %v2125_v62 = vmax.f32 %v2122_v11, 0.0  ;;  %v2124_v22 = vadd.f32 %v2118_v18, %v4100_v27  ;;  %v3266_v4 = vpack.c.bf16 %v2411_v25, %v2410_v10  ;;  %v2395_v11 = vld [vmem:[%s4234_s11 + $0x78] sm:$0xff]  ;;  %v2229_v28 = vrot.slane %v2224_v3, %v3539_v49 }
 0x383   :  { %v2126_v34 = vmax.f32 %v2123_v31, 0.0  ;;  %v3268_v27 = vpack.c.bf16 %v2395_v11, %v2394_v26  ;;  %v2233_v29 = vrot.slane %v2224_v3, %v3545_v51 }
 0x384   :  { %v2127_v23 = vmax.f32 %v2124_v22, 0.0  ;;  %3267 = vmatprep.subr.bf16.mxu0 %v3266_v4 }
 0x385   :  { %2300 = vmatprep.mubr.f32.mxu1 %v2126_v34  ;;  %3269 = vmatpush3.bf16.msra.mxu0 %v3268_v27 }
 0x386   :  { %2301 = vmatmul.mubr.f32.vlgmr.msra.gmra.mrb[2].mxu1 %v2125_v62 }
 0x387   :  { %3209 = vmatpush1.bf16.msra.mxu1 %v3208_v35  ;;  %2371 = vmatprep.mubr.f32.mxu1 %v3326_v2  ;;  %v3216_v2 = vpack.c.bf16 %v2202_v43, %v2200_v42 }
 0x388   :  { %3211 = vmatprep.subr.bf16.mxu1 %v3210_v36  ;;  %v2523_v36 = vld [vmem:[#allocation5] ss:$0 sm:$0xff] }
 0x38b   :  { %3213 = vmatpush1.bf16.msra.mxu1 %v3212_v40 }
 0x38c   :  { %3215 = vmatprep.subr.bf16.mxu1 %v3214_v41 }
 0x38f   :  { %3217 = vmatpush1.bf16.msra.mxu1 %v3216_v2 }
 0x390   :  { %3219 = vmatprep.subr.bf16.mxu1 %v3218_v47 }
 0x393   :  { %3221 = vmatpush1.bf16.msra.mxu1 %v3220_v58 }
 0x394   :  { %3223 = vmatprep.subr.bf16.mxu1 %v3222_v63 }
 0x397   :  { %3225 = vmatpush1.bf16.msra.mxu1 %v3224_v1 }
 0x398   :  { %3227 = vmatprep.subr.bf16.mxu1 %v3226_v7 }
 0x39b   :  { %3229 = vmatpush1.bf16.msra.mxu1 %v3228_v15 }
 0x39c   :  { %3231 = vmatprep.subr.bf16.mxu1 %v3230_v16 }
 0x39f   :  { %3233 = vmatpush1.bf16.msra.mxu1 %v3232_v57 }
 0x3a0   :  { %3235 = vmatprep.subr.bf16.mxu1 %v3234_v56 }
 0x3a3   :  { %3237 = vmatpush1.bf16.msra.mxu1 %v3236_v21 }
 0x3a6   :  { %2372 = vmatmul.mubr.f32.vlgmr.msra.gmra.mrb[2].mxu1 %v2127_v23 }
 0x479   :  { %v2373_v30 = vpop.f32.mrb[2].mxu1 }
 0x47a   :  { %v3270_v31 = vadd.f32 %v2373_v30, %v2229_v28  ;;  %v2375_v32 = vpop.f32.mrb[3].mxu1 }
 0x47b   :  { %v3271_v33 = vadd.f32 %v2375_v32, %v2233_v29 }
 0x47c   :  { %v2378_v35 = vmax.f32 %v3270_v31, 0.0 }
 0x47d   :  { %v2379_v34 = vmax.f32 %v3271_v33, 0.0 }
 0x47f   :  { %2483 = vmatprep.mubr.f32.mxu0 %v2379_v34 }
 0x480   :  { %2484 = vmatmul.mubr.f32.vlgmr.msra.gmra.mrb[36].mxu0 %v2378_v35 }
 0x553   :  { %v2688_v62 = vpop.f32.mrb[36].mxu0 }
 0x554   :  { %v2689_v37 = vpop.f32.mrb[37].mxu0 }
 0x555   :  { %v2690_v38 = vadd.f32 %v2689_v37, %v2688_v62 }
 0x557   :  { %v2486_v39 = vadd.f32 %v2690_v38, %v2523_v36 }
 0x559   :  { %2490 = vst.msk [vmem:[%s4236_s13] sm:$0x3] %vm2489_vm0, %v2486_v39 }
 0x55a   :  { %2495 = vsyncpa [#allocation7], 1 }

</bundles_post_ra>
